<compile_context>
chip_gen: v7x
topology: tpu7x:2x2x1
jax: 0.10.0
libtpu: 0.0.40
codegen_flags: <defaults>
</compile_context>

<pallas_src>
import jax
import jax.numpy as jnp
from jax.experimental import pallas as pl
from jax.experimental.pallas import tpu as pltpu


# ----------------------------------------------------------------------------
# Tile picker: largest multiple of 128 that divides T and keeps the framed
# audio tile (B, tile_t, F) f32 under ~4 MiB (double-buffered => ~8 MiB).
# ----------------------------------------------------------------------------
def _pick_tile_t(B, T, F, budget_bytes=4 * 1024 * 1024):
    best = 128
    t = 128
    while t <= T:
        if T % t == 0 and B * t * F * 4 <= budget_bytes:
            best = t
        t += 128
    return best


# ----------------------------------------------------------------------------
# Fused kernel: frame logits + Dice/BCE loss accumulation over frame tiles.
# Grid: (T // tile_t,) -- single "arbitrary" axis (it carries the reduction).
# ----------------------------------------------------------------------------
def _make_fused_kernel(B, T_total, smooth=1e-5):
    inv_B = 1.0 / float(B)
    inv_BT = 1.0 / float(B * T_total)

    def kernel(x_ref, w_ref, y_ref, b_ref,             # inputs
               logits_ref, loss_ref,                   # outputs
               inter_acc, pin_acc, tgt_acc, bce_acc):  # VMEM scratch
        t = pl.program_id(0)

        @pl.when(t == 0)
        def _init():
            inter_acc[...] = jnp.zeros_like(inter_acc)
            pin_acc[...] = jnp.zeros_like(pin_acc)
            tgt_acc[...] = jnp.zeros_like(tgt_acc)
            bce_acc[...] = jnp.zeros_like(bce_acc)

        x = x_ref[...]                      # (B, tile_t, F) f32
        w = w_ref[...]                      # (1, F) f32
        bias = b_ref[0, 0]                  # scalar from SMEM

        # Frame logits: VPU multiply + XLU lane-reduce over F.
        logits = jnp.sum(x * w[None, :, :], axis=-1) + bias   # (B, tile_t)
        logits_ref[...] = logits

        y = y_ref[...].astype(jnp.float32)                     # labels are bf16
        probs = jax.nn.sigmoid(logits)

        # per-lane partial sums; final lane reduction happens once at finalize
        inter_acc[...] += probs * y
        pin_acc[...] += probs
        tgt_acc[...] += y
        # numerically-stable BCE-with-logits elementwise terms
        bce_acc[...] += (jnp.maximum(logits, 0.0) - logits * y
                         + jnp.log1p(jnp.exp(-jnp.abs(logits))))

        @pl.when(t == pl.num_programs(0) - 1)
        def _finalize():
            inter = jnp.sum(inter_acc[...], axis=1, keepdims=True)   # (B, 1)
            s_in = jnp.sum(pin_acc[...], axis=1, keepdims=True)      # (B, 1)
            s_tg = jnp.sum(tgt_acc[...], axis=1, keepdims=True)      # (B, 1)
            # NOTE: smooth only in the denominator -- matches reference DiceLoss.
            dice = 2.0 * inter / (s_in + s_tg + smooth)              # (B, 1)
            dice_mean = jnp.sum(dice, axis=0, keepdims=True) * inv_B     # (1, 1)
            bce_row = jnp.sum(bce_acc[...], axis=1, keepdims=True)       # (B, 1)
            bce_mean = jnp.sum(bce_row, axis=0, keepdims=True) * inv_BT  # (1, 1)
            loss_ref[...] = (1.0 - dice_mean) + bce_mean

    return kernel


def fused_logits_and_loss(x, labels, w, b, *, tile_t=None):
    """x: (B, T, F) f32, labels: (B, T) bf16/f32, w: (1, F) f32, b: (1, 1) f32."""
    B, T, F = x.shape
    if tile_t is None:
        tile_t = _pick_tile_t(B, T, F)
    assert T % tile_t == 0 and tile_t % 128 == 0 and F % 128 == 0
    nt = T // tile_t

    logits, loss = pl.pallas_call(
        _make_fused_kernel(B, T),
        out_shape=(
            jax.ShapeDtypeStruct((B, T), jnp.float32),
            jax.ShapeDtypeStruct((1, 1), jnp.float32),
        ),
        grid_spec=pltpu.PrefetchScalarGridSpec(
            num_scalar_prefetch=0,
            grid=(nt,),
            in_specs=[
                pl.BlockSpec((B, tile_t, F), lambda t: (0, t, 0)),   # framed audio
                pl.BlockSpec((1, F), lambda t: (0, 0)),              # weight row
                pl.BlockSpec((B, tile_t), lambda t: (0, t)),         # labels tile
                pl.BlockSpec(memory_space=pltpu.MemorySpace.SMEM),   # bias scalar
            ],
            out_specs=(
                pl.BlockSpec((B, tile_t), lambda t: (0, t)),         # lane-dense logits
                pl.BlockSpec((1, 1), lambda t: (0, 0)),              # resident loss
            ),
            scratch_shapes=[
                pltpu.VMEM((B, tile_t), jnp.float32),
                pltpu.VMEM((B, tile_t), jnp.float32),
                pltpu.VMEM((B, tile_t), jnp.float32),
                pltpu.VMEM((B, tile_t), jnp.float32),
            ],
        ),
        compiler_params=pltpu.CompilerParams(
            # single grid axis carries the loss reduction -> "arbitrary"
            dimension_semantics=("arbitrary",),
            vmem_limit_bytes=32 * 1024 * 1024,
        ),
    )(x, w, labels, b)
    return logits, loss


# ----------------------------------------------------------------------------
# Inference path (labels is None): logits only, frame axis marked "parallel".
# ----------------------------------------------------------------------------
def _logits_kernel(x_ref, w_ref, b_ref, logits_ref):
    logits_ref[...] = (
        jnp.sum(x_ref[...] * w_ref[...][None, :, :], axis=-1) + b_ref[0, 0]
    )


def frame_logits(x, w, b, *, tile_t=None):
    B, T, F = x.shape
    if tile_t is None:
        tile_t = _pick_tile_t(B, T, F)
    assert T % tile_t == 0 and tile_t % 128 == 0 and F % 128 == 0
    nt = T // tile_t
    return pl.pallas_call(
        _logits_kernel,
        out_shape=jax.ShapeDtypeStruct((B, T), jnp.float32),
        grid_spec=pltpu.PrefetchScalarGridSpec(
            num_scalar_prefetch=0,
            grid=(nt,),
            in_specs=[
                pl.BlockSpec((B, tile_t, F), lambda t: (0, t, 0)),
                pl.BlockSpec((1, F), lambda t: (0, 0)),
                pl.BlockSpec(memory_space=pltpu.MemorySpace.SMEM),
            ],
            out_specs=pl.BlockSpec((B, tile_t), lambda t: (0, t)),
        ),
        compiler_params=pltpu.CompilerParams(
            dimension_semantics=("parallel",),
            vmem_limit_bytes=32 * 1024 * 1024,
        ),
    )(x, w, b)


# ----------------------------------------------------------------------------
# Model forward (mirrors Model.forward):
#   logits = audio_model(input_values)['logits'].squeeze(2)
#   loss   = DiceLoss()(logits, labels) + BCEWithLogitsLoss()(logits, labels)
# ----------------------------------------------------------------------------
def model_forward(input_values, labels, w, b, frame_size, *, tile_t=None):
    B, S = input_values.shape
    T = S // frame_size
    # row-major reshape is free; frame axis T becomes lanes in the logits layout
    x = input_values[:, : T * frame_size].reshape(B, T, frame_size)
    if labels is None:
        return None, frame_logits(x, w, b, tile_t=tile_t)
    logits, loss = fused_logits_and_loss(x, labels, w, b, tile_t=tile_t)
    return loss[0, 0], logits


if __name__ == "__main__":
    key = jax.random.PRNGKey(0)
    k_audio, k_w, k_lab = jax.random.split(key, 3)

    B = 2            # batch
    T = 256          # frames per clip
    F = 128          # samples per frame (stand-in receptive field)
    S = T * F        # raw audio samples

    input_values = jax.random.normal(k_audio, (B, S), dtype=jnp.float32)
    # labels shipped at 2 bytes (bf16); cast to f32 inside the kernel
    labels = (jax.random.uniform(k_lab, (B, T)) > 0.5).astype(jnp.bfloat16)
    w = jax.random.normal(k_w, (1, F), dtype=jnp.float32) * 0.02
    b = jnp.zeros((1, 1), dtype=jnp.float32)

    # training path, forced small tile -> exercises multi-step accumulation
    loss_small, logits_small = model_forward(input_values, labels, w, b, F, tile_t=128)
    # training path, auto (largest) tile
    loss, logits = model_forward(input_values, labels, w, b, F)
    jax.block_until_ready((loss_small, logits_small, loss, logits))

    # inference path (labels=None) should produce the same logits
    _, logits_inf = model_forward(input_values, None, w, b, F)
    jax.block_until_ready(logits_inf)

    # ---- pure-JAX reference -------------------------------------------------
    x3 = input_values.reshape(B, T, F)
    lg_ref = jnp.sum(x3 * w[:, None, :], axis=-1) + b[0, 0]       # (B, T)
    y = labels.astype(jnp.float32)
    probs = jax.nn.sigmoid(lg_ref)
    inter = (probs * y).sum(axis=1)
    dice = 2.0 * inter / (probs.sum(axis=1) + y.sum(axis=1) + 1e-5)
    dice_loss = 1.0 - dice.mean()
    bce = (jnp.maximum(lg_ref, 0.0) - lg_ref * y
           + jnp.log1p(jnp.exp(-jnp.abs(lg_ref)))).mean()
    ref_loss = dice_loss + bce

    assert logits.shape == (B, T)
    assert jnp.allclose(logits, lg_ref, rtol=1e-4, atol=1e-4)
    assert jnp.allclose(logits_small, lg_ref, rtol=1e-4, atol=1e-4)
    assert jnp.allclose(logits_inf, logits, rtol=1e-5, atol=1e-5)
    assert jnp.allclose(loss, ref_loss, rtol=1e-4, atol=1e-4), (loss, ref_loss)
    assert jnp.allclose(loss_small, ref_loss, rtol=1e-4, atol=1e-4), (loss_small, ref_loss)
    print("KERNEL_OK")
</pallas_src>

<mosaic_0001>
module attributes {stable_mosaic.version = 11 : i64} {
  func.func @kernel(%arg0: i32, %arg1: memref<2x128x128xf32, #tpu.memory_space<vmem>>, %arg2: memref<1x128xf32, #tpu.memory_space<vmem>>, %arg3: memref<2x128xbf16, #tpu.memory_space<vmem>>, %arg4: memref<1x1xf32, #tpu.memory_space<smem>>, %arg5: memref<2x128xf32, #tpu.memory_space<vmem>>, %arg6: memref<1x1xf32, #tpu.memory_space<vmem>>, %arg7: memref<2x128xf32, #tpu.memory_space<vmem>>, %arg8: memref<2x128xf32, #tpu.memory_space<vmem>>, %arg9: memref<2x128xf32, #tpu.memory_space<vmem>>, %arg10: memref<2x128xf32, #tpu.memory_space<vmem>>) attributes {dimension_semantics = [#tpu.dimension_semantics<arbitrary>], iteration_bounds = array<i64: 2>, scalar_prefetch = 0 : i64, scratch_operands = 4 : i64, tpu.core_type = #tpu.core_type<tc>, window_params = [{transform_indices = @transform_0, window_bounds = array<i64: 2, 128, 128>}, {pipeline_mode = #tpu.pipeline_mode<synchronous>, transform_indices = @transform_1, window_bounds = array<i64: 1, 128>}, {transform_indices = @transform_2, window_bounds = array<i64: 2, 128>}, {transform_indices = @transform_3, window_bounds = array<i64: 1, 1>}, {transform_indices = @transform_4, window_bounds = array<i64: 2, 128>}, {pipeline_mode = #tpu.pipeline_mode<synchronous>, transform_indices = @transform_5, window_bounds = array<i64: 1, 1>}]} {
    %c0_i32 = arith.constant 0 : i32
    %0 = arith.cmpi eq, %arg0, %c0_i32 : i32
    %1 = arith.extui %0 : i1 to i32
    %c0_i32_0 = arith.constant 0 : i32
    %2 = arith.cmpi ne, %1, %c0_i32_0 : i32
    scf.if %2 {
      %cst_31 = arith.constant 0.000000e+00 : f32
      %46 = vector.broadcast %cst_31 : f32 to vector<2x128xf32>
      %c0_32 = arith.constant 0 : index
      %c0_33 = arith.constant 0 : index
      %47 = vector.load %arg7[%c0_32, %c0_33] : memref<2x128xf32, #tpu.memory_space<vmem>>, vector<2x128xf32>
      tpu.vector_store %arg7[%c0_32, %c0_33], %46 {strides = array<i32>} : memref<2x128xf32, #tpu.memory_space<vmem>>, vector<2x128xf32>,
      %cst_34 = arith.constant 0.000000e+00 : f32
      %48 = vector.broadcast %cst_34 : f32 to vector<2x128xf32>
      %c0_35 = arith.constant 0 : index
      %c0_36 = arith.constant 0 : index
      %49 = vector.load %arg8[%c0_35, %c0_36] : memref<2x128xf32, #tpu.memory_space<vmem>>, vector<2x128xf32>
      tpu.vector_store %arg8[%c0_35, %c0_36], %48 {strides = array<i32>} : memref<2x128xf32, #tpu.memory_space<vmem>>, vector<2x128xf32>,
      %cst_37 = arith.constant 0.000000e+00 : f32
      %50 = vector.broadcast %cst_37 : f32 to vector<2x128xf32>
      %c0_38 = arith.constant 0 : index
      %c0_39 = arith.constant 0 : index
      %51 = vector.load %arg9[%c0_38, %c0_39] : memref<2x128xf32, #tpu.memory_space<vmem>>, vector<2x128xf32>
      tpu.vector_store %arg9[%c0_38, %c0_39], %50 {strides = array<i32>} : memref<2x128xf32, #tpu.memory_space<vmem>>, vector<2x128xf32>,
      %cst_40 = arith.constant 0.000000e+00 : f32
      %52 = vector.broadcast %cst_40 : f32 to vector<2x128xf32>
      %c0_41 = arith.constant 0 : index
      %c0_42 = arith.constant 0 : index
      %53 = vector.load %arg10[%c0_41, %c0_42] : memref<2x128xf32, #tpu.memory_space<vmem>>, vector<2x128xf32>
      tpu.vector_store %arg10[%c0_41, %c0_42], %52 {strides = array<i32>} : memref<2x128xf32, #tpu.memory_space<vmem>>, vector<2x128xf32>,
    } else {
    }
    %c0 = arith.constant 0 : index
    %c0_1 = arith.constant 0 : index
    %c0_2 = arith.constant 0 : index
    %3 = vector.load %arg1[%c0, %c0_1, %c0_2] : memref<2x128x128xf32, #tpu.memory_space<vmem>>, vector<2x128x128xf32>
    %c0_3 = arith.constant 0 : index
    %c0_4 = arith.constant 0 : index
    %4 = vector.load %arg2[%c0_3, %c0_4] : memref<1x128xf32, #tpu.memory_space<vmem>>, vector<1x128xf32>
    %c0_5 = arith.constant 0 : index
    %c0_6 = arith.constant 0 : index
    %5 = memref.load %arg4[%c0_5, %c0_6] : memref<1x1xf32, #tpu.memory_space<smem>>
    %6 = vector.shape_cast %4 : vector<1x128xf32> to vector<1x1x128xf32>
    %7 = vector.broadcast %6 : vector<1x1x128xf32> to vector<2x128x128xf32>
    %8 = arith.mulf %3, %7 : vector<2x128x128xf32>
    %cst = arith.constant dense<0.000000e+00> : vector<2x128xf32>
    %9 = vector.multi_reduction <add>, %8, %cst [2] : vector<2x128x128xf32> to vector<2x128xf32>
    %10 = vector.broadcast %5 : f32 to vector<2x128xf32>
    %11 = arith.addf %9, %10 : vector<2x128xf32>
    %c0_7 = arith.constant 0 : index
    %c0_8 = arith.constant 0 : index
    %12 = vector.load %arg5[%c0_7, %c0_8] : memref<2x128xf32, #tpu.memory_space<vmem>>, vector<2x128xf32>
    tpu.vector_store %arg5[%c0_7, %c0_8], %11 {strides = array<i32>} : memref<2x128xf32, #tpu.memory_space<vmem>>, vector<2x128xf32>,
    %c0_9 = arith.constant 0 : index
    %c0_10 = arith.constant 0 : index
    %13 = vector.load %arg3[%c0_9, %c0_10] : memref<2x128xbf16, #tpu.memory_space<vmem>>, vector<2x128xbf16>
    %14 = arith.extf %13 : vector<2x128xbf16> to vector<2x128xf32>
    %15 = arith.negf %11 : vector<2x128xf32>
    %16 = math.exp %15 : vector<2x128xf32>
    %cst_11 = arith.constant 1.000000e+00 : f32
    %17 = vector.broadcast %cst_11 : f32 to vector<2x128xf32>
    %18 = arith.addf %17, %16 : vector<2x128xf32>
    %19 = arith.divf %17, %18 : vector<2x128xf32>
    %c0_12 = arith.constant 0 : index
    %c0_13 = arith.constant 0 : index
    %20 = vector.load %arg7[%c0_12, %c0_13] : memref<2x128xf32, #tpu.memory_space<vmem>>, vector<2x128xf32>
    %21 = arith.mulf %19, %14 : vector<2x128xf32>
    %22 = arith.addf %20, %21 : vector<2x128xf32>
    %c0_14 = arith.constant 0 : index
    %c0_15 = arith.constant 0 : index
    %23 = vector.load %arg7[%c0_14, %c0_15] : memref<2x128xf32, #tpu.memory_space<vmem>>, vector<2x128xf32>
    tpu.vector_store %arg7[%c0_14, %c0_15], %22 {strides = array<i32>} : memref<2x128xf32, #tpu.memory_space<vmem>>, vector<2x128xf32>,
    %c0_16 = arith.constant 0 : index
    %c0_17 = arith.constant 0 : index
    %24 = vector.load %arg8[%c0_16, %c0_17] : memref<2x128xf32, #tpu.memory_space<vmem>>, vector<2x128xf32>
    %25 = arith.addf %24, %19 : vector<2x128xf32>
    %c0_18 = arith.constant 0 : index
    %c0_19 = arith.constant 0 : index
    %26 = vector.load %arg8[%c0_18, %c0_19] : memref<2x128xf32, #tpu.memory_space<vmem>>, vector<2x128xf32>
    tpu.vector_store %arg8[%c0_18, %c0_19], %25 {strides = array<i32>} : memref<2x128xf32, #tpu.memory_space<vmem>>, vector<2x128xf32>,
    %c0_20 = arith.constant 0 : index
    %c0_21 = arith.constant 0 : index
    %27 = vector.load %arg9[%c0_20, %c0_21] : memref<2x128xf32, #tpu.memory_space<vmem>>, vector<2x128xf32>
    %28 = arith.addf %27, %14 : vector<2x128xf32>
    %c0_22 = arith.constant 0 : index
    %c0_23 = arith.constant 0 : index
    %29 = vector.load %arg9[%c0_22, %c0_23] : memref<2x128xf32, #tpu.memory_space<vmem>>, vector<2x128xf32>
    tpu.vector_store %arg9[%c0_22, %c0_23], %28 {strides = array<i32>} : memref<2x128xf32, #tpu.memory_space<vmem>>, vector<2x128xf32>,
    %c0_24 = arith.constant 0 : index
    %c0_25 = arith.constant 0 : index
    %30 = vector.load %arg10[%c0_24, %c0_25] : memref<2x128xf32, #tpu.memory_space<vmem>>, vector<2x128xf32>
    %cst_26 = arith.constant 0.000000e+00 : f32
    %31 = vector.broadcast %cst_26 : f32 to vector<2x128xf32>
    %32 = arith.maximumf %11, %31 : vector<2x128xf32>
    %33 = arith.mulf %11, %14 : vector<2x128xf32>
    %34 = arith.subf %32, %33 : vector<2x128xf32>
    %35 = math.absf %11 : vector<2x128xf32>
    %cst_27 = arith.constant 0.000000e+00 : f32
    %36 = vector.broadcast %cst_27 : f32 to vector<2x128xf32>
    %37 = arith.subf %36, %35 : vector<2x128xf32>
    %38 = math.exp %37 : vector<2x128xf32>
    %39 = math.log1p %38 : vector<2x128xf32>
    %40 = arith.addf %34, %39 : vector<2x128xf32>
    %41 = arith.addf %30, %40 : vector<2x128xf32>
    %c0_28 = arith.constant 0 : index
    %c0_29 = arith.constant 0 : index
    %42 = vector.load %arg10[%c0_28, %c0_29] : memref<2x128xf32, #tpu.memory_space<vmem>>, vector<2x128xf32>
    tpu.vector_store %arg10[%c0_28, %c0_29], %41 {strides = array<i32>} : memref<2x128xf32, #tpu.memory_space<vmem>>, vector<2x128xf32>,
    %c1_i32 = arith.constant 1 : i32
    %43 = arith.cmpi eq, %arg0, %c1_i32 : i32
    %44 = arith.extui %43 : i1 to i32
    %c0_i32_30 = arith.constant 0 : i32
    %45 = arith.cmpi ne, %44, %c0_i32_30 : i32
    scf.if %45 {
      %c0_31 = arith.constant 0 : index
      %c0_32 = arith.constant 0 : index
      %46 = vector.load %arg7[%c0_31, %c0_32] : memref<2x128xf32, #tpu.memory_space<vmem>>, vector<2x128xf32>
      %cst_33 = arith.constant dense<0.000000e+00> : vector<2xf32>
      %47 = vector.multi_reduction <add>, %46, %cst_33 [1] : vector<2x128xf32> to vector<2xf32>
      %48 = vector.shape_cast %47 : vector<2xf32> to vector<2x1xf32>
      %c0_34 = arith.constant 0 : index
      %c0_35 = arith.constant 0 : index
      %49 = vector.load %arg8[%c0_34, %c0_35] : memref<2x128xf32, #tpu.memory_space<vmem>>, vector<2x128xf32>
      %cst_36 = arith.constant dense<0.000000e+00> : vector<2xf32>
      %50 = vector.multi_reduction <add>, %49, %cst_36 [1] : vector<2x128xf32> to vector<2xf32>
      %51 = vector.shape_cast %50 : vector<2xf32> to vector<2x1xf32>
      %c0_37 = arith.constant 0 : index
      %c0_38 = arith.constant 0 : index
      %52 = vector.load %arg9[%c0_37, %c0_38] : memref<2x128xf32, #tpu.memory_space<vmem>>, vector<2x128xf32>
      %cst_39 = arith.constant dense<0.000000e+00> : vector<2xf32>
      %53 = vector.multi_reduction <add>, %52, %cst_39 [1] : vector<2x128xf32> to vector<2xf32>
      %54 = vector.shape_cast %53 : vector<2xf32> to vector<2x1xf32>
      %cst_40 = arith.constant 2.000000e+00 : f32
      %55 = vector.broadcast %cst_40 : f32 to vector<2x1xf32>
      %56 = arith.mulf %55, %48 : vector<2x1xf32>
      %57 = arith.addf %51, %54 : vector<2x1xf32>
      %cst_41 = arith.constant 9.99999974E-6 : f32
      %58 = vector.broadcast %cst_41 : f32 to vector<2x1xf32>
      %59 = arith.addf %57, %58 : vector<2x1xf32>
      %60 = arith.divf %56, %59 : vector<2x1xf32>
      %cst_42 = arith.constant dense<0.000000e+00> : vector<1xf32>
      %61 = vector.multi_reduction <add>, %60, %cst_42 [0] : vector<2x1xf32> to vector<1xf32>
      %62 = vector.shape_cast %61 : vector<1xf32> to vector<1x1xf32>
      %cst_43 = arith.constant 5.000000e-01 : f32
      %63 = vector.broadcast %cst_43 : f32 to vector<1x1xf32>
      %64 = arith.mulf %62, %63 : vector<1x1xf32>
      %c0_44 = arith.constant 0 : index
      %c0_45 = arith.constant 0 : index
      %65 = vector.load %arg10[%c0_44, %c0_45] : memref<2x128xf32, #tpu.memory_space<vmem>>, vector<2x128xf32>
      %cst_46 = arith.constant dense<0.000000e+00> : vector<2xf32>
      %66 = vector.multi_reduction <add>, %65, %cst_46 [1] : vector<2x128xf32> to vector<2xf32>
      %67 = vector.shape_cast %66 : vector<2xf32> to vector<2x1xf32>
      %cst_47 = arith.constant dense<0.000000e+00> : vector<1xf32>
      %68 = vector.multi_reduction <add>, %67, %cst_47 [0] : vector<2x1xf32> to vector<1xf32>
      %69 = vector.shape_cast %68 : vector<1xf32> to vector<1x1xf32>
      %cst_48 = arith.constant 0.001953125 : f32
      %70 = vector.broadcast %cst_48 : f32 to vector<1x1xf32>
      %71 = arith.mulf %69, %70 : vector<1x1xf32>
      %cst_49 = arith.constant 1.000000e+00 : f32
      %72 = vector.broadcast %cst_49 : f32 to vector<1x1xf32>
      %73 = arith.subf %72, %64 : vector<1x1xf32>
      %74 = arith.addf %73, %71 : vector<1x1xf32>
      %c0_50 = arith.constant 0 : index
      %c0_51 = arith.constant 0 : index
      %75 = vector.load %arg6[%c0_50, %c0_51] : memref<1x1xf32, #tpu.memory_space<vmem>>, vector<1x1xf32>
      tpu.vector_store %arg6[%c0_50, %c0_51], %74 {strides = array<i32>} : memref<1x1xf32, #tpu.memory_space<vmem>>, vector<1x1xf32>,
    } else {
    }
    return
  }
  func.func @transform_0(%arg0: i32) -> (i32, i32, i32) {
    %c0_i32 = arith.constant 0 : i32
    %c0_i32_0 = arith.constant 0 : i32
    %c0_i32_1 = arith.constant 0 : i32
    return %c0_i32, %arg0, %c0_i32_0 : i32, i32, i32
  }
  func.func @transform_1(%arg0: i32) -> (i32, i32) {
    %c0_i32 = arith.constant 0 : i32
    %c0_i32_0 = arith.constant 0 : i32
    %c0_i32_1 = arith.constant 0 : i32
    return %c0_i32, %c0_i32_0 : i32, i32
  }
  func.func @transform_2(%arg0: i32) -> (i32, i32) {
    %c0_i32 = arith.constant 0 : i32
    %c0_i32_0 = arith.constant 0 : i32
    return %c0_i32, %arg0 : i32, i32
  }
  func.func @transform_3(%arg0: i32) -> (i32, i32) {
    %c0_i32 = arith.constant 0 : i32
    %c0_i32_0 = arith.constant 0 : i32
    %c0_i32_1 = arith.constant 0 : i32
    return %c0_i32, %c0_i32_0 : i32, i32
  }
  func.func @transform_4(%arg0: i32) -> (i32, i32) {
    %c0_i32 = arith.constant 0 : i32
    %c0_i32_0 = arith.constant 0 : i32
    return %c0_i32, %arg0 : i32, i32
  }
  func.func @transform_5(%arg0: i32) -> (i32, i32) {
    %c0_i32 = arith.constant 0 : i32
    %c0_i32_0 = arith.constant 0 : i32
    %c0_i32_1 = arith.constant 0 : i32
    return %c0_i32, %c0_i32_0 : i32, i32
  }
}

</mosaic_0001>

<bundles_post_ra>
// kernel: tpu_custom_call.1
= control target key start
LH: loop header
LB: loop body
LE: loop exit
PB: predicated region body
PF: predicated region fallthrough
CT: control target
= control target key end

     0   :  { %s4788_s0 = inlined_call_operand.hbm [shape: f32[2,256,128], index: 0, kind: input, shape index: {}]   ;;  %s4789_s1 = inlined_call_operand.vmem [shape: f32[1,128], index: 1, kind: input, shape index: {}]   ;;  %s4790_s2 = inlined_call_operand.vmem [shape: bf16[2,256], index: 2, kind: input, shape index: {}]   ;;  %s4791_s3 = inlined_call_operand.<no memory space> [shape: f32[1,1], index: 3, kind: input, shape index: {}]   ;;  %s4792_s4 = inlined_call_operand.hbm [shape: f32[2,256], index: 4, kind: output, shape index: {0}]   ;;  %s4793_s5 = inlined_call_operand.hbm [shape: f32[1,1], index: 5, kind: output, shape index: {1}]  }
   0x1   :  { %11 = sst [smem:[#allocation6]] %s4791_s3 }
   0x2   :  { %12 = vsyncpa [#allocation8], 0 }
   0x3   :  { %14 = vsyncpa [#allocation8 + $0x1], 0 }
   0x4   :  { %15 = vsyncpa [#allocation9], 0 }
   0x5   :  { %17 = vsyncpa [#allocation9 + $0x1], 0 }
   0x6   :  { %18 = vsyncpa [#allocation12], 0  ;;  %s3090_s20 = smov 0   ;;  %s3092_s21 = smov 0  }
   0x7   :  { %s3094_s22 = smov 0   ;;  %s3096_s23 = smov 0  }
   0x8 LB: > { %s3111_s3 = sadd.s32 4294967295, %s3044_s23   ;;  %s2571_s24 = sadd.s32 4294967294, %s3044_s23   ;;  %s3044_s23 = sphi %s3096_s23, %s5256_s23   ;;  %s3040_s22 = sphi %s3094_s22, %s5255_s22   ;;  %s3036_s21 = sphi %s3092_s21, %s5254_s21   ;;  %s3032_s20 = sphi %s3090_s20, %s5253_s20  }
   0x9   : > { %s3115_s25 = sadd.s32 1, %s3044_s23   ;;  %s31_s26 = sadd.s32 1, %s3040_s22 }
   0xa   : > { %s28_s27 = ssub.s32 %s3044_s23, %s3115_s25  ;;  %p38_p0 = scmp.ne.s32.totalorder %s3040_s22, %s3036_s21 }
   0xb   : > { %p29_p1 = scmp.eq.s32.totalorder %s28_s27, 0  ;;  %p39_p2 = scmp.eq.s32.totalorder %s3044_s23, 0 }
   0xc   : > { %p44_p3 = scmp.ne.s32.totalorder %s3036_s21, %s3032_s20  ;;  %p45_p4 = scmp.eq.s32.totalorder %s3111_s3, 0 }
   0xd   : > { %s3127_s28 = scalar_select %p29_p1, %s3040_s22, %s31_s26  }
   0xe   : > { %p3129_p5 = por %p39_p2, %p38_p0  ;;  %p3133_p6 = por %p45_p4, %p44_p3 }
   0xf   : > { %p136_p7 = scmp.eq.s32.totalorder %s3111_s3, 1  ;;  %p142_p8 = scmp.eq.s32.totalorder %s2571_s24, 1 }
  0x10   : > { %p4934_p11 = scmp.ge.s32.totalorder %s3044_s23, 2 }
  0x11   : > { %p3140_p9 = por %p136_p7, %p38_p0  ;;  %p3144_p10 = por %p142_p8, %p44_p3 }
  0x12   : > { %185 = sbr.rel (%p4934_p11) target bundleno = 38 (0x26), region = 24 }
  0x19   : > { %s189_s8 = sand.u32 1, %s3040_s22   ;;  %s2623_s9 = sshll.u32 %s3044_s23, 11 }
  0x1a   : > { %s2574_s10 = sshll.u32 %s189_s8, 8  ;;  %s199_s13 = scalar_lea.hbm %s4788_s0, %s2623_s9 }
  0x1b   : > { %s2624_s14 = scalar_select %p3129_p5, [#allocation0], [#allocation15] }
  0x1c   : > { %s193_s15 = scalar_lea.vmem [#allocation7], %s2574_s10  ;;  %s3046_s18 = smov 4096  }
  0x1d   : > { %s212_s16 = sshll.u32 %s193_s15, 4  ;;  %s204_s17 = sld [smem:[%s2624_s14]]   ;;  %s213_s16 = int_to_ptr.vmem [resolvable:$true] %s212_s16 }
  0x1e   : > { %2625 = sst [smem:[#allocation14]] (%p3129_p5), %s3046_s18  ;;  %s3047_s19 = smov 2048  }
  0x1f   : > { %2626 = sst [smem:[#allocation14 + $0x1]] (%p3129_p5), %s3047_s19  ;;  %s3048_s24 = smov 16  }
  0x20   : > { %2627 = sst [smem:[#allocation14 + $0x2]] (%p3129_p5), %s3048_s24  ;;  %s3049_s26 = smov 128  }
  0x21   : > { %2628 = sst [smem:[#allocation14 + $0x3]] (%p3129_p5), %s3049_s26  ;;  %s3050_s9 = smov 8  }
  0x22   : > { %2629 = sst [smem:[#allocation14 + $0x4]] (%p3129_p5), %s3049_s26  ;;  %s190_s11 = scalar_lea.sflag [#allocation8], %s189_s8 }
  0x23   : > { %s2577_s27 = sshll.u32 %s204_s17, 26  ;;  %2630 = sst [smem:[#allocation14 + $0x5]] (%p3129_p5), %s3050_s9 }
  0x24   : > { %s2578_s10 = sadd.s32 134217728, %s2577_s27  ;;  %s3051_s12 = smov [#allocation13]  }
  0x25   : > { %2631 = dma.general (%p3129_p5), %s199_s13, 4096, %s213_s16, %s190_s11, %s3051_s12, [#allocation14], %s2578_s10, 0  }
  0x26 PF: > { %p2579_p12 = scmp.ge.s32.totalorder %s3044_s23, 1  ;;  %p239_p13 = scmp.lt.s32.totalorder %s3044_s23, 3 }
  0x28   : > { %p240_p0 = pnand %p2579_p12, %p239_p13 }
  0x2a   : > { %243 = sbr.rel (%p240_p0) target bundleno = 838 (0x346), region = 36 }
  0x31   : > { %s3175_s14 = sand.u32 1, %s3036_s21  }
  0x32   : > { %s2580_s15 = sshll.u32 %s3175_s14, 8  ;;  %s246_s17 = scalar_lea.sflag [#allocation8], %s3175_s14 }
  0x33   : > { %s3179_s18 = scalar_lea.vmem [#allocation7], %s2580_s15 }
  0x34   : > { %3019 = dma.done.wait (%p3133_p6), %s246_s17, 4096  }
  0x35   : > { %3021 = vsyncadd (%p3133_p6), %s246_s17, 4294963200  ;;  %s2581_s29 = sshll.u32 %s3175_s14, 1  ;;  %p280_p1 = scmp.lt.s32.totalorder %s3111_s3, 1 }
  0x36   : > { %s3194_s24 = scalar_lea.vmem [#allocation10], %s2581_s29  ;;  %p2582_p2 = scmp.ne.s32.totalorder %s3111_s3, 0 }
  0x37   : > { %s3188_s8 = scalar_select %p280_p1, %s3111_s3, 1 }
  0x38   : > { %286 = sbr.rel (%p2582_p2) target bundleno = 63 (0x3f), region = 44  ;;  %v3052_v0 = vmov (!%p2582_p2), 0.0  }
  0x39   : > { %s282_s19 = scalar_lea.vmem %s4790_s2, %s3188_s8  ;;  %287 = vst [vmem:[#allocation2] sm:$0x3] (!%p2582_p2), %v3052_v0  ;;  %288 = vst [vmem:[#allocation3] sm:$0x3] (!%p2582_p2), %v3052_v0 }
  0x3a   : > { %289 = vst [vmem:[#allocation4] sm:$0x3] (!%p2582_p2), %v3052_v0  ;;  %290 = vst [vmem:[#allocation5] sm:$0x3] (!%p2582_p2), %v3052_v0 }
  0x3f PF: > { %v293_v1 = vld [vmem:[%s3179_s18 + $0x10] sm:$0xff]  ;;  %v3201_v2 = vld [vmem:[%s4789_s1] ss:$0 sm:$0xff]  ;;  %v291_v3 = vld [vmem:[%s3179_s18] sm:$0xff]  ;;  %v492_v12 = vlaneseq  ;;  %s324_s10 = sld [smem:[#allocation6]]  ;;  %vm503_vm0 = vcmask 130112  }
  0x40   : > { %v333_v4 = vmul.f32 %v3201_v2, %v293_v1  ;;  %v331_v5 = vmul.f32 %v3201_v2, %v291_v3  ;;  %v294_v6 = vld [vmem:[%s3179_s18 + $0x18] sm:$0xff]  ;;  %v292_v7 = vld [vmem:[%s3179_s18 + $0x8] sm:$0xff]  ;;  %v295_v11 = vld [vmem:[%s3179_s18 + $0x20] sm:$0xff]  ;;  %vm510_vm1 = vcmask 195712   ;;  %vm517_vm2 = vcmask 261312   ;;  %p2616_p3 = scmp.ne.s32.totalorder %s3111_s3, 1 }
  0x41   : > { %v334_v8 = vmul.f32 %v3201_v2, %v294_v6  ;;  %v332_v9 = vmul.f32 %v3201_v2, %v292_v7  ;;  %v296_v10 = vld [vmem:[%s3179_s18 + $0x28] sm:$0xff]  ;;  %v335_v14 = vmul.f32 %v3201_v2, %v295_v11  ;;  %v3214_v15 = vand.u32 127, %v492_v12  ;;  %v298_v16 = vld [vmem:[%s3179_s18 + $0x38] sm:$0xff]  ;;  %v297_v17 = vld [vmem:[%s3179_s18 + $0x30] sm:$0xff] }
  0x42   : > { %367 = vadd.xlane.f32.xlu1 %v333_v4  ;;  %363 = vadd.xlane.f32.xlu0 %v331_v5  ;;  %v336_v13 = vmul.f32 %v3201_v2, %v296_v10  ;;  %v3219_v19 = vshrl.u32 %v492_v12, 7  ;;  %v338_v20 = vmul.f32 %v3201_v2, %v298_v16  ;;  %v337_v21 = vmul.f32 %v3201_v2, %v297_v17  ;;  %v3228_v22 = vld [vmem:[%s282_s19] sm:$0x1]  ;;  %v1572_v23 = vld [vmem:[#allocation4] sm:$0x3]  ;;  %v300_v24 = vld [vmem:[%s3179_s18 + $0x48] sm:$0xff] }
  0x43   : > { %v505_v18 = vadd.s32 4294967280, %v3214_v15  ;;  %v299_v25 = vld [vmem:[%s3179_s18 + $0x40] sm:$0xff]  ;;  %v687_v26 = vunpack.c.l.bf16 %v3228_v22  ;;  %v340_v29 = vmul.f32 %v3201_v2, %v300_v24  ;;  %v302_v31 = vld [vmem:[%s3179_s18 + $0x58] sm:$0xff]  ;;  %v301_v32 = vld [vmem:[%s3179_s18 + $0x50] sm:$0xff]  ;;  %v512_v37 = vadd.s32 4294967272, %v3214_v15 }
  0x44   : > { %v339_v30 = vmul.f32 %v3201_v2, %v299_v25  ;;  %v342_v33 = vmul.f32 %v3201_v2, %v302_v31  ;;  %v341_v34 = vmul.f32 %v3201_v2, %v301_v32  ;;  %v304_v35 = vld [vmem:[%s3179_s18 + $0x68] sm:$0xff]  ;;  %v303_v36 = vld [vmem:[%s3179_s18 + $0x60] sm:$0xff]  ;;  %v3249_v38 = vsub.s32 %v3214_v15, %v3219_v19  ;;  %v306_v44 = vld [vmem:[%s3179_s18 + $0x78] sm:$0xff] }
  0x45   : > { %v3234_v27 = vsub.s32 %v505_v18, %v3219_v19  ;;  %v1573_v28 = vadd.f32 %v1572_v23, %v687_v26  ;;  %v498_v39 = vadd.s32 4294967288, %v3214_v15  ;;  %v3253_v40 = vsub.s32 %v512_v37, %v3219_v19  ;;  %v305_v45 = vld [vmem:[%s3179_s18 + $0x70] sm:$0xff]  ;;  %v308_v50 = vld [vmem:[%s3179_s18 + $0x88] sm:$0xff]  ;;  %v307_v51 = vld [vmem:[%s3179_s18 + $0x80] sm:$0xff] }
  0x46   : > { %369 = vadd.xlane.f32.xlu1 %v334_v8  ;;  %365 = vadd.xlane.f32.xlu0 %v332_v9  ;;  %4940 = vst [vmem:[#allocation20_spill] sm:$0xff] %v3249_v38  ;;  %v344_v41 = vmul.f32 %v3201_v2, %v304_v35  ;;  %v343_v42 = vmul.f32 %v3201_v2, %v303_v36  ;;  %v526_v46 = vadd.s32 4294967256, %v3214_v15  ;;  %v519_v47 = vadd.s32 4294967264, %v3214_v15  ;;  %v310_v58 = vld [vmem:[%s3179_s18 + $0x98] sm:$0xff]  ;;  %v309_v59 = vld [vmem:[%s3179_s18 + $0x90] sm:$0xff]  ;;  %v312_v3 = vld [vmem:[%s3179_s18 + $0xa8] sm:$0xff] }
  0x47   : > { %4939 = vst [vmem:[#allocation19_spill] sm:$0xff] %v3234_v27  ;;  %1574 = vst [vmem:[#allocation4] sm:$0x3] %v1573_v28  ;;  %v3258_v43 = vsub.s32 %v498_v39, %v3219_v19  ;;  %v346_v48 = vmul.f32 %v3201_v2, %v306_v44  ;;  %v345_v49 = vmul.f32 %v3201_v2, %v305_v45  ;;  %v540_v54 = vadd.s32 4294967240, %v3214_v15  ;;  %v311_v4 = vld [vmem:[%s3179_s18 + $0xa0] sm:$0xff]  ;;  %v314_v9 = vld [vmem:[%s3179_s18 + $0xb8] sm:$0xff] }
  0x48   : > { %4941 = vst [vmem:[#allocation21_spill] sm:$0xff] %v3253_v40  ;;  %v3269_v52 = vsub.s32 %v526_v46, %v3219_v19  ;;  %v3272_v53 = vsub.s32 %v519_v47, %v3219_v19  ;;  %v533_v55 = vadd.s32 4294967248, %v3214_v15  ;;  %v348_v56 = vmul.f32 %v3201_v2, %v308_v50  ;;  %v313_v10 = vld [vmem:[%s3179_s18 + $0xb0] sm:$0xff]  ;;  %v316_v18 = vld [vmem:[%s3179_s18 + $0xc8] sm:$0xff]  ;;  %v322_v44 = vld [vmem:[%s3179_s18 + $0xf8] sm:$0xff] }
  0x49   : > { %4942 = vst [vmem:[#allocation22_spill] sm:$0xff] %v3258_v43  ;;  %v347_v57 = vmul.f32 %v3201_v2, %v307_v51  ;;  %v3281_v60 = vsub.s32 %v540_v54, %v3219_v19  ;;  %v350_v62 = vmul.f32 %v3201_v2, %v310_v58  ;;  %v349_v63 = vmul.f32 %v3201_v2, %v309_v59  ;;  %v317_v31 = vld [vmem:[%s3179_s18 + $0xd0] sm:$0xff]  ;;  %v320_v39 = vld [vmem:[%s3179_s18 + $0xe8] sm:$0xff] }
  0x4a   : > { %373 = vadd.xlane.f32.xlu1 %v336_v13  ;;  %371 = vadd.xlane.f32.xlu0 %v335_v14  ;;  %4943 = vst [vmem:[#allocation23_spill] sm:$0xff] %v3269_v52  ;;  %4944 = vst [vmem:[#allocation24_spill] sm:$0xff] %v3272_v53  ;;  %v3284_v61 = vsub.s32 %v533_v55, %v3219_v19  ;;  %v554_v0 = vadd.s32 4294967224, %v3214_v15  ;;  %v547_v1 = vadd.s32 4294967232, %v3214_v15  ;;  %v568_v11 = vadd.s32 4294967208, %v3214_v15  ;;  %v321_v45 = vld [vmem:[%s3179_s18 + $0xf0] sm:$0xff] }
  0x4b   : > { %4945 = vst [vmem:[#allocation25_spill] sm:$0xff] %v3281_v60  ;;  %v352_v7 = vmul.f32 %v3201_v2, %v312_v3  ;;  %v351_v8 = vmul.f32 %v3201_v2, %v311_v4  ;;  %v561_v12 = vadd.s32 4294967216, %v3214_v15  ;;  %v354_v16 = vmul.f32 %v3201_v2, %v314_v9 }
  0x4c   : > { %4946 = vst [vmem:[#allocation26_spill] sm:$0xff] %v3284_v61  ;;  %v3293_v5 = vsub.s32 %v554_v0, %v3219_v19  ;;  %v3296_v6 = vsub.s32 %v547_v1, %v3219_v19  ;;  %v3305_v13 = vsub.s32 %v568_v11, %v3219_v19  ;;  %v353_v17 = vmul.f32 %v3201_v2, %v313_v10 }
  0x4d   : > { %v3308_v14 = vsub.s32 %v561_v12, %v3219_v19  ;;  %v575_v23 = vadd.s32 4294967200, %v3214_v15  ;;  %v356_v28 = vmul.f32 %v3201_v2, %v316_v18  ;;  %v596_v32 = vadd.s32 4294967176, %v3214_v15 }
  0x4e   : > { %377 = vadd.xlane.f32.xlu1 %v338_v20  ;;  %375 = vadd.xlane.f32.xlu0 %v337_v21  ;;  %4947 = vst [vmem:[#allocation27_spill] sm:$0xff] %v3293_v5  ;;  %4948 = vst [vmem:[#allocation28_spill] sm:$0xff] %v3296_v6  ;;  %v315_v20 = vld [vmem:[%s3179_s18 + $0xc0] sm:$0xff]  ;;  %v582_v21 = vadd.s32 4294967192, %v3214_v15  ;;  %v357_v35 = vmul.f32 %v3201_v2, %v317_v31  ;;  %v362_v46 = vmul.f32 %v3201_v2, %v322_v44  ;;  %vm524_vm3 = vcmask 326912  }
  0x4f   : > { %4949 = vst [vmem:[#allocation29_spill] sm:$0xff] %v3305_v13  ;;  %4950 = vst [vmem:[#allocation30_spill] sm:$0xff] %v3308_v14  ;;  %v3320_v25 = vsub.s32 %v575_v23, %v3219_v19  ;;  %v3331_v36 = vsub.s32 %v596_v32, %v3219_v19  ;;  %v361_v47 = vmul.f32 %v3201_v2, %v321_v45  ;;  %v891_v55 = vsub.s32 0, %v3219_v19 }
  0x50   : > { %v3317_v24 = vsub.s32 %v582_v21, %v3219_v19  ;;  %v3371_v21 = vstv %s324_s10  ;;  %vm531_vm4 = vcmask 392512   ;;  %vm538_vm5 = vcmask 458112  }
  0x51   : > { %4952 = vst [vmem:[#allocation32_spill] sm:$0xff] %v3320_v25  ;;  %4953 = vst [vmem:[#allocation33_spill] sm:$0xff] %v3331_v36  ;;  %vm545_vm6 = vcmask 523712   ;;  %vm552_vm7 = vcmask 589312   ;;  %vm4933_vm8 = vcmask 654912   ;;  %vm4931_vm9 = vcmask 720512  }
  0x52   : > { %381 = vadd.xlane.f32.xlu1 %v340_v29  ;;  %379 = vadd.xlane.f32.xlu0 %v339_v30  ;;  %4951 = vst [vmem:[#allocation31_spill] sm:$0xff] %v3317_v24  ;;  %v355_v29 = vmul.f32 %v3201_v2, %v315_v20  ;;  %v318_v30 = vld [vmem:[%s3179_s18 + $0xd8] sm:$0xff]  ;;  %vm4932_vm10 = vcmask 786112   ;;  %vm580_vm11 = vcmask 851712   ;;  %vm4912_vm12 = vcmask 917312  }
  0x53   : > { %vm4906_vm13 = vcmask 982912  }
  0x56   : > { %385 = vadd.xlane.f32.xlu1 %v342_v33  ;;  %383 = vadd.xlane.f32.xlu0 %v341_v34  ;;  %v589_v33 = vadd.s32 4294967184, %v3214_v15  ;;  %v358_v34 = vmul.f32 %v3201_v2, %v318_v30 }
  0x58   : > { %v3334_v37 = vsub.s32 %v589_v33, %v3219_v19 }
  0x5a   : > { %389 = vadd.xlane.f32.xlu1 %v344_v41  ;;  %387 = vadd.xlane.f32.xlu0 %v343_v42  ;;  %4954 = vst [vmem:[#allocation34_spill] sm:$0xff] %v3334_v37  ;;  %v319_v41 = vld [vmem:[%s3179_s18 + $0xe0] sm:$0xff]  ;;  %v360_v42 = vmul.f32 %v3201_v2, %v320_v39 }
  0x5b   : > { %v359_v15 = vmul.f32 %v3201_v2, %v319_v41  ;;  %v958_v2 = vsub.s32 1, %v3219_v19 }
  0x5e   : > { %393 = vadd.xlane.f32.xlu1 %v346_v48  ;;  %391 = vadd.xlane.f32.xlu0 %v345_v49  ;;  %v3053_v48 = vmov 1983009808  }
  0x5f   : > { %v883_v49 = vunpack.c.l.s4 %v3053_v48 }
  0x61   : > { %v884_v50 = vunpack.c.0.s8 %v883_v49 }
  0x62   : > { %397 = vadd.xlane.f32.xlu1 %v348_v56  ;;  %395 = vadd.xlane.f32.xlu0 %v347_v57 }
  0x63   : > { %v887_v51 = vsub.s32 %v884_v50, %v3219_v19 }
  0x65   : > { %v888_v54 = vrot.slane %v687_v26, %v887_v51  ;;  %v3054_v26 = vmov 0  }
  0x66   : > { %401 = vadd.xlane.f32.xlu1 %v350_v62  ;;  %399 = vadd.xlane.f32.xlu0 %v349_v63 }
  0x67   : > { %v892_v56 = vrot.slane %v888_v54, %v891_v55  ;;  %v959_v22 = vrot.slane %v888_v54, %v958_v2  ;;  %2689 = vset.pattern.permute.xlu1 %v3054_v26  ;;  %2688 = vset.pattern.permute.xlu0 %v3054_v26 }
  0x6a   : > { %405 = vadd.xlane.f32.xlu1 %v352_v7  ;;  %403 = vadd.xlane.f32.xlu0 %v351_v8 }
  0x6e   : > { %409 = vadd.xlane.f32.xlu1 %v354_v16  ;;  %407 = vadd.xlane.f32.xlu0 %v353_v17 }
  0x72   : > { %413 = vadd.xlane.f32.xlu1 %v356_v28  ;;  %411 = vadd.xlane.f32.xlu0 %v355_v29 }
  0x76   : > { %417 = vadd.xlane.f32.xlu1 %v358_v34  ;;  %415 = vadd.xlane.f32.xlu0 %v357_v35 }
  0x7a   : > { %421 = vadd.xlane.f32.xlu1 %v360_v42  ;;  %419 = vadd.xlane.f32.xlu0 %v359_v15 }
  0x7e   : > { %425 = vadd.xlane.f32.xlu1 %v362_v46  ;;  %423 = vadd.xlane.f32.xlu0 %v361_v47 }
  0x8f   : > { %898 = vbcast.lane.b32.xlu1 %v892_v56, 264 }
  0x93   : > { %902 = vbcast.lane.b32.xlu1 %v892_v56, 272 }
  0x94   : > { %894 = vbcast.lane.b32.xlu0 %v892_v56, 256 }
  0x97   : > { %906 = vbcast.lane.b32.xlu1 %v892_v56, 280 }
  0x98   : > { %910 = vbcast.lane.b32.xlu0 %v892_v56, 288 }
  0x9b   : > { %914 = vbcast.lane.b32.xlu1 %v892_v56, 296 }
  0x9c   : > { %918 = vbcast.lane.b32.xlu0 %v892_v56, 304 }
  0x9f   : > { %922 = vbcast.lane.b32.xlu1 %v892_v56, 312 }
  0xa0   : > { %926 = vbcast.lane.b32.xlu0 %v892_v56, 320 }
  0xa3   : > { %930 = vbcast.lane.b32.xlu1 %v892_v56, 328 }
  0xa4   : > { %934 = vbcast.lane.b32.xlu0 %v892_v56, 336 }
  0xa7   : > { %938 = vbcast.lane.b32.xlu1 %v892_v56, 344 }
  0xa8   : > { %942 = vbcast.lane.b32.xlu0 %v892_v56, 352 }
  0xab   : > { %946 = vbcast.lane.b32.xlu1 %v892_v56, 360 }
  0xac   : > { %950 = vbcast.lane.b32.xlu0 %v892_v56, 368 }
  0xaf   : > { %954 = vbcast.lane.b32.xlu1 %v892_v56, 376 }
  0xb0   : > { %961 = vbcast.lane.b32.xlu0 %v959_v22, 256 }
  0xb3   : > { %965 = vbcast.lane.b32.xlu1 %v959_v22, 264 }
  0xb4   : > { %969 = vbcast.lane.b32.xlu0 %v959_v22, 272 }
  0xb7   : > { %973 = vbcast.lane.b32.xlu1 %v959_v22, 280 }
  0xb8   : > { %977 = vbcast.lane.b32.xlu0 %v959_v22, 288 }
  0xbb   : > { %981 = vbcast.lane.b32.xlu1 %v959_v22, 296 }
  0xbc   : > { %985 = vbcast.lane.b32.xlu0 %v959_v22, 304 }
  0xbf   : > { %989 = vbcast.lane.b32.xlu1 %v959_v22, 312 }
  0xc0   : > { %993 = vbcast.lane.b32.xlu0 %v959_v22, 320 }
  0xc3   : > { %997 = vbcast.lane.b32.xlu1 %v959_v22, 328 }
  0xc4   : > { %1001 = vbcast.lane.b32.xlu0 %v959_v22, 336 }
  0xc7   : > { %1005 = vbcast.lane.b32.xlu1 %v959_v22, 344 }
  0xc8   : > { %1009 = vbcast.lane.b32.xlu0 %v959_v22, 352 }
  0xcb   : > { %1013 = vbcast.lane.b32.xlu1 %v959_v22, 360 }
  0xcc   : > { %1017 = vbcast.lane.b32.xlu0 %v959_v22, 368 }
  0xcf   : > { %v368_v19 = vpop.xlane.xlu1 %367  ;;  %v364_v57 = vpop.xlane.xlu0 %363  ;;  %1021 = vbcast.lane.b32.xlu1 %v959_v22, 376 }
  0xd0   : > { %v3376_v28 = vadd.f32 %v3371_v21, %v368_v19  ;;  %v3381_v30 = vadd.f32 %v3371_v21, %v364_v57 }
  0xd2   : > { %v1674_v32 = vand.u32 2147483647, %v3376_v28  ;;  %v1672_v39 = vand.u32 2147483647, %v3381_v30  ;;  %v2586_v49 = vmul.f32 -1.442695, %v3376_v28 }
  0xd3   : > { %v370_v58 = vpop.xlane.xlu1 %369  ;;  %v366_v59 = vpop.xlane.xlu0 %365  ;;  %v2584_v51 = vmul.f32 -1.442695, %v3381_v30 }
  0xd4   : > { %v3384_v31 = vadd.f32 %v3371_v21, %v370_v58  ;;  %v3388_v33 = vadd.f32 %v3371_v21, %v366_v59  ;;  %v1706_v15 = vsub.f32 0.0, %v1674_v32  ;;  %v1704_v47 = vsub.f32 0.0, %v1672_v39 }
  0xd6   : > { %4955 = vst [vmem:[#allocation35_spill] sm:$0xff] %v3384_v31  ;;  %v1675_v41 = vand.u32 2147483647, %v3384_v31  ;;  %v2585_v44 = vmul.f32 -1.442695, %v3388_v33 }
  0xd7   : > { %v374_v62 = vpop.xlane.xlu1 %373  ;;  %v372_v63 = vpop.xlane.xlu0 %371  ;;  %v1673_v45 = vand.u32 2147483647, %v3388_v33  ;;  %v1740_v2 = vmul.f32 1.442695, %v1706_v15  ;;  %v1736_v57 = vmul.f32 1.442695, %v1704_v47 }
  0xd8   : > { %v3397_v42 = vadd.f32 %v3371_v21, %v374_v62  ;;  %v3404_v48 = vadd.f32 %v3371_v21, %v372_v63  ;;  %v1707_v54 = vsub.f32 0.0, %v1675_v41  ;;  %2690 = vpow2.f32 %v2585_v44 }
  0xd9   : > { %v1705_v22 = vsub.f32 0.0, %v1673_v45  ;;  %2692 = vpow2.f32 %v2586_v49  ;;  %v2587_v59 = vmul.f32 -1.442695, %v3384_v31 }
  0xda   : > { %v1677_v55 = vand.u32 2147483647, %v3397_v42  ;;  %v1676_v58 = vand.u32 2147483647, %v3404_v48  ;;  %2694 = vpow2.f32 %v2584_v51  ;;  %v1742_v62 = vmul.f32 1.442695, %v1707_v54 }
  0xdb   : > { %v378_v0 = vpop.xlane.xlu1 %377  ;;  %v376_v1 = vpop.xlane.xlu0 %375  ;;  %2696 = vpow2.f32 %v1740_v2  ;;  %v1738_v32 = vmul.f32 1.442695, %v1705_v22  ;;  %v2588_v44 = vmul.f32 -1.442695, %v3404_v48 }
  0xdc   : > { %v3412_v56 = vadd.f32 %v3371_v21, %v378_v0  ;;  %v3415_v26 = vadd.f32 %v3371_v21, %v376_v1  ;;  %v1709_v63 = vsub.f32 0.0, %v1677_v55  ;;  %2698 = vpow2.f32 %v1736_v57 }
  0xdd   : > { %v2589_v1 = vmul.f32 -1.442695, %v3397_v42  ;;  %v1708_v15 = vsub.f32 0.0, %v1676_v58  ;;  %2700 = vpow2.f32 %v2587_v59 }
  0xde   : > { %4956 = vst [vmem:[#allocation36_spill] sm:$0xff] %v3412_v56  ;;  %v1679_v0 = vand.u32 2147483647, %v3412_v56  ;;  %v1678_v39 = vand.u32 2147483647, %v3415_v26  ;;  %2702 = vpow2.f32 %v1742_v62 }
  0xdf   : > { %v382_v3 = vpop.xlane.xlu1 %381  ;;  %v3349_v4 = vpop.xlane.xlu0 %379  ;;  %v1746_v49 = vmul.f32 1.442695, %v1709_v63  ;;  %2704 = vpow2.f32 %v1738_v32  ;;  %v2591_v55 = vmul.f32 -1.442695, %v3412_v56  ;;  %v1744_v22 = vmul.f32 1.442695, %v1708_v15 }
  0xe0   : > { %v3428_v45 = vadd.f32 %v3371_v21, %v382_v3  ;;  %v1711_v51 = vsub.f32 0.0, %v1679_v0  ;;  %v3434_v54 = vadd.f32 %v3371_v21, %v3349_v4  ;;  %v1710_v2 = vsub.f32 0.0, %v1678_v39 }
  0xe1   : > { %2706 = vpow2.f32 %v2589_v1  ;;  %v2590_v3 = vmul.f32 -1.442695, %v3415_v26 }
  0xe2   : > { %4959 = vst [vmem:[#allocation39_spill] sm:$0xff] %v3434_v54  ;;  %v2691_v57 = vpop.eup %2690  ;;  %2708 = vpow2.f32 %v2588_v44  ;;  %v1681_v58 = vand.u32 2147483647, %v3428_v45  ;;  %v1750_v62 = vmul.f32 1.442695, %v1711_v51 }
  0xe3   : > { %v3351_v7 = vpop.xlane.xlu1 %385  ;;  %v3353_v8 = vpop.xlane.xlu0 %383  ;;  %2710 = vpow2.f32 %v1746_v49  ;;  %v1680_v63 = vand.u32 2147483647, %v3434_v54  ;;  %v1748_v32 = vmul.f32 1.442695, %v1710_v2  ;;  %v785_v15 = vadd.f32 1.0, %v2691_v57 }
  0xe4   : > { %v3444_v4 = vadd.f32 %v3371_v21, %v3351_v7  ;;  %v2693_v0 = vpop.eup %2692  ;;  %2712 = vpow2.f32 %v2591_v55  ;;  %v2593_v49 = vmul.f32 -1.442695, %v3428_v45  ;;  %v1713_v51 = vsub.f32 0.0, %v1681_v58 }
  0xe5   : > { %v2695_v1 = vpop.eup %2694  ;;  %2714 = vpow2.f32 %v1744_v22  ;;  %v2592_v37 = vmul.f32 -1.442695, %v3434_v54  ;;  %v1712_v7 = vsub.f32 0.0, %v1680_v63  ;;  %v3460_v57 = vadd.f32 %v3371_v21, %v3353_v8 }
  0xe6   : > { %v3448_v44 = vpop.eup %2696  ;;  %2716 = vpow2.f32 %v2590_v3  ;;  %v1683_v55 = vand.u32 2147483647, %v3444_v4  ;;  %v2595_v22 = vmul.f32 -1.442695, %v3444_v4  ;;  %v1577_v58 = vmax.f32 %v3388_v33, 0.0 }
  0xe7   : > { %v3355_v9 = vpop.xlane.xlu1 %389  ;;  %v3357_v10 = vpop.xlane.xlu0 %387  ;;  %4960 = vst [vmem:[#allocation40_spill] sm:$0xff] %v3448_v44  ;;  %2718 = vpow2.f32 %v1750_v62  ;;  %v784_v62 = vadd.f32 1.0, %v2695_v1  ;;  %v1752_v25 = vmul.f32 1.442695, %v1712_v7 }
  0xe8   : > { %v3452_v36 = vpop.eup %2698  ;;  %2720 = vpow2.f32 %v1748_v32  ;;  %v1715_v14 = vsub.f32 0.0, %v1683_v55 }
  0xe9   : > { %4961 = vst [vmem:[#allocation41_spill] sm:$0xff] %v3452_v36  ;;  %v2701_v24 = vpop.eup %2700  ;;  %2722 = vrcp.f32 %v785_v15  ;;  %v1754_v36 = vmul.f32 1.442695, %v1713_v51  ;;  %v786_v15 = vadd.f32 1.0, %v2693_v0 }
  0xea   : > { %v3465_v44 = vpop.eup %2702  ;;  %2724 = vpow2.f32 %v2593_v49  ;;  %v2594_v49 = vmul.f32 -1.442695, %v3460_v57 }
  0xeb   : > { %v3359_v11 = vpop.xlane.xlu1 %393  ;;  %v3361_v12 = vpop.xlane.xlu0 %391  ;;  %4963 = vst [vmem:[#allocation43_spill] sm:$0xff] %v3465_v44  ;;  %2726 = vpow2.f32 %v2592_v37  ;;  %v3483_v37 = vadd.f32 %v3371_v21, %v3357_v10 }
  0xec   : > { %v3467_v63 = vpop.eup %2704  ;;  %2728 = vpow2.f32 %v2595_v22  ;;  %v3498_v44 = vadd.f32 %v3371_v21, %v3359_v11 }
  0xed   : > { %4964 = vst [vmem:[#allocation44_spill] sm:$0xff] %v3467_v63  ;;  %v2707_v32 = vpop.eup %2706  ;;  %2730 = vrcp.f32 %v784_v62  ;;  %v1684_v10 = vand.u32 2147483647, %v3483_v37 }
  0xee   : > { %v2709_v8 = vpop.eup %2708  ;;  %2732 = vpow2.f32 %v1754_v36  ;;  %4972 = vst [vmem:[#allocation52_spill] sm:$0xff] %v3498_v44 }
  0xef   : > { %v3363_v16 = vpop.xlane.xlu1 %397  ;;  %v3365_v17 = vpop.xlane.xlu0 %395  ;;  %2734 = vpow2.f32 %v1752_v25  ;;  %v787_v25 = vadd.f32 1.0, %v2701_v24  ;;  %v1716_v24 = vsub.f32 0.0, %v1684_v10  ;;  %v2599_v10 = vmul.f32 -1.442695, %v3498_v44 }
  0xf0   : > { %v3476_v1 = vpop.eup %2710  ;;  %2736 = vrcp.f32 %v786_v15 }
  0xf1   : > { %4967 = vst [vmem:[#allocation47_spill] sm:$0xff] %v3476_v1  ;;  %v3479_v51 = vpop.eup %2712  ;;  %2738 = vpow2.f32 %v2594_v49 }
  0xf2   : > { %v3487_v55 = vpop.eup %2714 }
  0xf3   : > { %v3367_v18 = vpop.xlane.xlu1 %401  ;;  %v3373_v23 = vpop.xlane.xlu0 %399  ;;  %4969 = vst [vmem:[#allocation49_spill] sm:$0xff] %v3487_v55  ;;  %v2596_v55 = vmul.f32 -1.442695, %v3483_v37 }
  0xf7   : > { %v3369_v20 = vpop.xlane.xlu1 %405  ;;  %v3390_v34 = vpop.xlane.xlu0 %403 }
  0xfb   : > { %v3378_v29 = vpop.xlane.xlu1 %409  ;;  %v3407_v50 = vpop.xlane.xlu0 %407 }
  0xff   : > { %v3392_v35 = vpop.xlane.xlu1 %413  ;;  %v3423_v41 = vpop.xlane.xlu0 %411 }
 0x103   : > { %v3401_v46 = vpop.xlane.xlu1 %417  ;;  %v3439_v59 = vpop.xlane.xlu0 %415 }
 0x107   : > { %v3417_v19 = vpop.xlane.xlu1 %421  ;;  %v3462_v3 = vpop.xlane.xlu0 %419 }
 0x108   : > { %4957 = vst [vmem:[#allocation37_spill] sm:$0xff] %v3417_v19  ;;  %4962 = vst [vmem:[#allocation42_spill] sm:$0xff] %v3462_v3  ;;  %v1682_v3 = vand.u32 2147483647, %v3460_v57  ;;  %v3474_v19 = vadd.f32 %v3371_v21, %v3355_v9  ;;  %v1758_v9 = vmul.f32 1.442695, %v1715_v14 }
 0x10a   : > { %4966 = vst [vmem:[#allocation46_spill] sm:$0xff] %v3474_v19  ;;  %v1714_v0 = vsub.f32 0.0, %v1682_v3  ;;  %v2597_v22 = vmul.f32 -1.442695, %v3474_v19  ;;  %v1685_v36 = vand.u32 2147483647, %v3474_v19 }
 0x10b   : > { %v3430_v47 = vpop.xlane.xlu1 %425  ;;  %v3485_v7 = vpop.xlane.xlu0 %423 }
 0x10c   : > { %4958 = vst [vmem:[#allocation38_spill] sm:$0xff] %v3430_v47  ;;  %4968 = vst [vmem:[#allocation48_spill] sm:$0xff] %v3485_v7  ;;  %v1717_v11 = vsub.f32 0.0, %v1685_v36  ;;  %v502_v36 = vrot.slane %v3388_v33, %v3258_v43 }
 0x10f   : > { %v3446_v39 = vpop.permute.xlu1 %898  ;;  %v3503_v49 = vpop.permute.xlu0 %894 }
 0x110   : > { %v1609_v2 = vmul.f32 %v3446_v39, %v3388_v33  ;;  %4973 = vst [vmem:[#allocation53_spill] sm:$0xff] %v3503_v49  ;;  %v3529_v33 = vadd.f32 %v3371_v21, %v3363_v16 }
 0x112   : > { %v3469_v47 = vsub.f32 %v1577_v58, %v1609_v2  ;;  %v2717_v2 = vpop.eup %2716  ;;  %v788_v58 = vadd.f32 1.0, %v2709_v8  ;;  %v1756_v8 = vmul.f32 1.442695, %v1714_v0  ;;  %v3514_v0 = vadd.f32 %v3371_v21, %v3361_v12  ;;  %4978 = vst [vmem:[#allocation58_spill] sm:$0xff] %v3529_v33 }
 0x113   : > { %v3490_v62 = vpop.eup %2718  ;;  %v3507_v1 = vpop.permute.xlu1 %902 }
 0x114   : > { %4965 = vst [vmem:[#allocation45_spill] sm:$0xff] %v3469_v47  ;;  %4970 = vst [vmem:[#allocation50_spill] sm:$0xff] %v3490_v62  ;;  %v3493_v47 = vpop.eup %2720  ;;  %2740 = vrcp.f32 %v788_v58  ;;  %v497_v62 = vrot.slane %v3381_v30, %v3249_v38  ;;  %v790_v58 = vadd.f32 1.0, %v2717_v2  ;;  %v789_v2 = vadd.f32 1.0, %v2707_v32 }
 0x115   : > { %4971 = vst [vmem:[#allocation51_spill] sm:$0xff] %v3493_v47  ;;  %v2723_v14 = vpop.eup %2722  ;;  %2742 = vpow2.f32 %v1758_v9  ;;  %4974 = vst [vmem:[#allocation54_spill] sm:$0xff] %v3507_v1  ;;  %v1687_v47 = vand.u32 2147483647, %v3498_v44  ;;  %v1760_v32 = vmul.f32 1.442695, %v1716_v24  ;;  %v3533_v44 = vpop.permute.xlu0 %910 }
 0x116   : > { %v3500_v3 = vpop.eup %2724  ;;  %2744 = vpow2.f32 %v2597_v22  ;;  %v1056_v15 = vmul.f32 %v2723_v14, %v3446_v39  ;;  %4975 = vst [vmem:[#allocation55_spill] sm:$0xff] %v3514_v0  ;;  %v1417_v39 = vrot.slane %v2723_v14, %v3258_v43  ;;  %v1762_v14 = vmul.f32 1.442695, %v1717_v11 }
 0x117   : > { %v2727_v63 = vpop.eup %2726  ;;  %2746 = vrcp.f32 %v787_v25 }
 0x118   : > { %v3509_v9 = vpop.eup %2728  ;;  %1123 = vperm.xlu1 %2689, %v1056_v15   ;;  %2748 = vrcp.f32 %v790_v58  ;;  %v1719_v58 = vsub.f32 0.0, %v1687_v47  ;;  %v509_v47 = vrot.slane %v3376_v28, %v3234_v27 }
 0x119   : > { %v2731_v22 = vpop.eup %2730  ;;  %2750 = vpow2.f32 %v1756_v8  ;;  %v1686_v8 = vand.u32 2147483647, %v3514_v0 }
 0x11a   : > { %v3520_v25 = vpop.eup %2732  ;;  %v1413_v19 = vrot.slane %v2731_v22, %v3249_v38  ;;  %v1055_v12 = vmul.f32 %v2731_v22, %v3503_v49  ;;  %2752 = vrcp.f32 %v789_v2  ;;  %v3540_v2 = vpop.permute.xlu1 %906 }
 0x11b   : > { %4976 = vst [vmem:[#allocation56_spill] sm:$0xff] %v3520_v25  ;;  %v3525_v7 = vpop.eup %2734  ;;  %2754 = vpow2.f32 %v2596_v55  ;;  %4979 = vst [vmem:[#allocation59_spill] sm:$0xff] %v3540_v2  ;;  %v1689_v55 = vand.u32 2147483647, %v3529_v33 }
 0x11c   : > { %4977 = vst [vmem:[#allocation57_spill] sm:$0xff] %v3525_v7  ;;  %v2737_v15 = vpop.eup %2736  ;;  %v1418_v25 = vsel %vm503_vm0, %v1417_v39, %v1413_v19  ;;  %1120 = vperm.xlu0 %2688, %v1055_v12   ;;  %v504_v7 = vsel %vm503_vm0, %v502_v36, %v497_v62  ;;  %2756 = vpow2.f32 %v2599_v10  ;;  %v2598_v19 = vmul.f32 -1.442695, %v3514_v0 }
 0x11d   : > { %v3535_v22 = vpop.eup %2738  ;;  %v1422_v11 = vrot.slane %v2737_v15, %v3234_v27  ;;  %v1057_v16 = vmul.f32 %v2737_v15, %v3507_v1  ;;  %2758 = vpow2.f32 %v1762_v14  ;;  %v3550_v62 = vadd.f32 %v3371_v21, %v3365_v17 }
 0x11e   : > { %v2741_v24 = vpop.eup %2740  ;;  %v511_v15 = vsel %vm510_vm1, %v509_v47, %v504_v7  ;;  %2760 = vpow2.f32 %v1760_v32  ;;  %v1766_v10 = vmul.f32 1.442695, %v1719_v58  ;;  %v1718_v1 = vsub.f32 0.0, %v1686_v8  ;;  %v3566_v58 = vpop.permute.xlu0 %918 }
 0x11f   : > { %v3545_v39 = vpop.eup %2742  ;;  %4981 = vst [vmem:[#allocation61_spill] sm:$0xff] %v3550_v62  ;;  %v1423_v36 = vsel %vm510_vm1, %v1422_v11, %v1418_v25  ;;  %1126 = vperm.xlu1 %2689, %v1057_v16   ;;  %v3558_v14 = vadd.f32 %v3371_v21, %v3367_v18  ;;  %v1059_v17 = vmul.f32 %v2741_v24, %v3533_v44  ;;  %v792_v0 = vadd.f32 1.0, %v2727_v63  ;;  %v3570_v47 = vpop.permute.xlu1 %914 }
 0x120   : > { %4980 = vst [vmem:[#allocation60_spill] sm:$0xff] %v3545_v39  ;;  %v3553_v12 = vpop.eup %2744  ;;  %v1432_v39 = vrot.slane %v2741_v24, %v3272_v53  ;;  %v516_v25 = vrot.slane %v3384_v31, %v3253_v40  ;;  %2762 = vpow2.f32 %v2598_v19  ;;  %v2601_v11 = vmul.f32 -1.442695, %v3529_v33  ;;  %4983 = vst [vmem:[#allocation63_spill] sm:$0xff] %v3570_v47 }
 0x121   : > { %v2747_v49 = vpop.eup %2746  ;;  %4982 = vst [vmem:[#allocation62_spill] sm:$0xff] %v3558_v14  ;;  %v1721_v18 = vsub.f32 0.0, %v1689_v55  ;;  %v1688_v16 = vand.u32 2147483647, %v3550_v62  ;;  %2764 = vrcp.f32 %v792_v0  ;;  %v1764_v19 = vmul.f32 1.442695, %v1718_v1 }
 0x122   : > { %v1427_v7 = vrot.slane %v2747_v49, %v3253_v40  ;;  %v1058_v32 = vmul.f32 %v2747_v49, %v3540_v2  ;;  %v2749_v8 = vpop.eup %2748  ;;  %v518_v24 = vsel %vm517_vm2, %v516_v25, %v511_v15  ;;  %2766 = vpow2.f32 %v1766_v10 }
 0x123   : > { %1132 = vperm.xlu1 %2689, %v1059_v17   ;;  %v3572_v63 = vpop.eup %2750  ;;  %v1691_v31 = vand.u32 2147483647, %v3558_v14  ;;  %v3579_v55 = vadd.f32 %v3371_v21, %v3373_v23  ;;  %v1061_v17 = vmul.f32 %v2749_v8, %v3566_v58  ;;  %v1442_v15 = vrot.slane %v2749_v8, %v3284_v61 }
 0x124   : > { %4984 = vst [vmem:[#allocation64_spill] sm:$0xff] %v3572_v63  ;;  %v1428_v49 = vsel %vm517_vm2, %v1427_v7, %v1423_v36  ;;  %1129 = vperm.xlu0 %2688, %v1058_v32   ;;  %v2753_v2 = vpop.eup %2752  ;;  %v2600_v63 = vmul.f32 -1.442695, %v3550_v62  ;;  %2768 = vpow2.f32 %v2601_v11  ;;  %v1770_v25 = vmul.f32 1.442695, %v1721_v18 }
 0x125   : > { %4985 = vst [vmem:[#allocation65_spill] sm:$0xff] %v3579_v55  ;;  %v1433_v0 = vsel %vm524_vm3, %v1432_v39, %v1428_v49  ;;  %v1437_v1 = vrot.slane %v2753_v2, %v3269_v52  ;;  %v1060_v36 = vmul.f32 %v2753_v2, %v3570_v47  ;;  %v2755_v10 = vpop.eup %2754  ;;  %v1720_v7 = vsub.f32 0.0, %v1688_v16 }
 0x126   : > { %v791_v23 = vadd.f32 1.0, %v3479_v51  ;;  %v3588_v32 = vpop.eup %2756  ;;  %v523_v39 = vrot.slane %v3404_v48, %v3272_v53  ;;  %2770 = vpow2.f32 %v1764_v19  ;;  %v3594_v8 = vadd.f32 %v3371_v21, %v3369_v20 }
 0x127   : > { %1138 = vperm.xlu1 %2689, %v1061_v17   ;;  %v1438_v49 = vsel %vm531_vm4, %v1437_v1, %v1433_v0  ;;  %v3597_v2 = vpop.eup %2758  ;;  %v2603_v11 = vmul.f32 -1.442695, %v3558_v14  ;;  %v1723_v18 = vsub.f32 0.0, %v1691_v31  ;;  %v1690_v51 = vand.u32 2147483647, %v3579_v55  ;;  %v3606_v1 = vpop.permute.xlu0 %926 }
 0x128   : > { %4986 = vst [vmem:[#allocation66_spill] sm:$0xff] %v3594_v8  ;;  %1135 = vperm.xlu0 %2688, %v1060_v36   ;;  %4987 = vst [vmem:[#allocation67_spill] sm:$0xff] %v3597_v2  ;;  %2772 = vrcp.f32 %v791_v23  ;;  %v3601_v16 = vpop.eup %2760  ;;  %v2602_v19 = vmul.f32 -1.442695, %v3579_v55  ;;  %v1443_v17 = vsel %vm538_vm5, %v1442_v15, %v1438_v49  ;;  %v794_v20 = vadd.f32 1.0, %v3535_v22 }
 0x129   : > { %4988 = vst [vmem:[#allocation68_spill] sm:$0xff] %v3601_v16  ;;  %2774 = vpow2.f32 %v2600_v63  ;;  %v1768_v0 = vmul.f32 1.442695, %v1720_v7  ;;  %4989 = vst [vmem:[#allocation69_spill] sm:$0xff] %v3606_v1  ;;  %v530_v31 = vrot.slane %v3397_v42, %v3269_v52  ;;  %v525_v23 = vsel %vm524_vm3, %v523_v39, %v518_v24 }
 0x12a   : > { %2776 = vpow2.f32 %v1770_v25  ;;  %v3608_v36 = vpop.eup %2762  ;;  %v537_v2 = vrot.slane %v3415_v26, %v3284_v61  ;;  %v1774_v22 = vmul.f32 1.442695, %v1723_v18  ;;  %v1722_v15 = vsub.f32 0.0, %v1690_v51 }
 0x12b   : > { %2778 = vrcp.f32 %v794_v20  ;;  %v2765_v63 = vpop.eup %2764  ;;  %v2605_v7 = vmul.f32 -1.442695, %v3594_v8  ;;  %v793_v16 = vadd.f32 1.0, %v3500_v3  ;;  %v1693_v24 = vand.u32 2147483647, %v3594_v8 }
 0x12c   : > { %2780 = vpow2.f32 %v2603_v11  ;;  %v3615_v25 = vpop.eup %2766  ;;  %v1063_v49 = vmul.f32 %v2765_v63, %v3606_v1  ;;  %v3623_v39 = vadd.f32 %v3371_v21, %v3390_v34  ;;  %v544_v18 = vrot.slane %v3412_v56, %v3281_v60 }
 0x12d   : > { %4990 = vst [vmem:[#allocation70_spill] sm:$0xff] %v3615_v25  ;;  %2782 = vpow2.f32 %v2602_v19  ;;  %v3630_v51 = vadd.f32 %v3371_v21, %v3378_v29  ;;  %v532_v20 = vsel %vm531_vm4, %v530_v31, %v525_v23  ;;  %v1772_v34 = vmul.f32 1.442695, %v1722_v15 }
 0x12e   : > { %2784 = vpow2.f32 %v1768_v0  ;;  %4991 = vst [vmem:[#allocation71_spill] sm:$0xff] %v3623_v39  ;;  %1144 = vperm.xlu1 %2689, %v1063_v49   ;;  %v3633_v3 = vpop.eup %2768  ;;  %v3636_v0 = vpop.permute.xlu1 %922  ;;  %v796_v11 = vadd.f32 1.0, %v2755_v10  ;;  %v539_v56 = vsel %vm538_vm5, %v537_v2, %v532_v20  ;;  %v551_v29 = vrot.slane %v3434_v54, %v3296_v6 }
 0x12f   : > { %4992 = vst [vmem:[#allocation72_spill] sm:$0xff] %v3630_v51  ;;  %2786 = vrcp.f32 %v793_v16  ;;  %4993 = vst [vmem:[#allocation73_spill] sm:$0xff] %v3636_v0  ;;  %v3645_v16 = vadd.f32 %v3371_v21, %v3407_v50  ;;  %v1725_v19 = vsub.f32 0.0, %v1693_v24  ;;  %v1692_v31 = vand.u32 2147483647, %v3623_v39  ;;  %v3655_v50 = vpop.permute.xlu0 %934 }
 0x130   : > { %2788 = vpow2.f32 %v1774_v22  ;;  %v3638_v25 = vpop.eup %2770  ;;  %v1452_v23 = vrot.slane %v2765_v63, %v3296_v6  ;;  %v2604_v2 = vmul.f32 -1.442695, %v3623_v39  ;;  %v1695_v22 = vand.u32 2147483647, %v3630_v51 }
 0x131   : > { %4994 = vst [vmem:[#allocation74_spill] sm:$0xff] %v3638_v25  ;;  %2790 = vpow2.f32 %v2605_v7  ;;  %4995 = vst [vmem:[#allocation75_spill] sm:$0xff] %v3645_v16  ;;  %v546_v63 = vsel %vm545_vm6, %v544_v18, %v539_v56  ;;  %v2607_v1 = vmul.f32 -1.442695, %v3630_v51  ;;  %v3668_v54 = vadd.f32 %v3371_v21, %v3392_v35 }
 0x132   : > { %v2773_v49 = vpop.eup %2772  ;;  %2792 = vrcp.f32 %v796_v11  ;;  %v1724_v24 = vsub.f32 0.0, %v1692_v31  ;;  %v1694_v56 = vand.u32 2147483647, %v3645_v16  ;;  %v3681_v35 = vsel %vm552_vm7, %v551_v29, %v546_v63 }
 0x133   : > { %v3649_v10 = vpop.eup %2774  ;;  %v1447_v15 = vrot.slane %v2773_v49, %v3281_v60  ;;  %v1062_v7 = vmul.f32 %v2773_v49, %v3636_v0  ;;  %2794 = vpow2.f32 %v1772_v34  ;;  %4997 = vst [vmem:[#allocation77_spill] sm:$0xff] %v3668_v54  ;;  %v1778_v47 = vmul.f32 1.442695, %v1725_v19 }
 0x134   : > { %v3657_v20 = vpop.eup %2776  ;;  %2796 = vpow2.f32 %v2604_v2  ;;  %v610_v31 = vrot.slane %v3529_v33, %v3258_v43  ;;  %v2606_v19 = vmul.f32 -1.442695, %v3645_v16  ;;  %v1697_v2 = vand.u32 2147483647, %v3668_v54 }
 0x135   : > { %4996 = vst [vmem:[#allocation76_spill] sm:$0xff] %v3657_v20  ;;  %v3663_v25 = vpop.eup %2778  ;;  %v1448_v49 = vsel %vm545_vm6, %v1447_v15, %v1443_v17  ;;  %1141 = vperm.xlu0 %2688, %v1062_v7   ;;  %v795_v20 = vadd.f32 1.0, %v3509_v9  ;;  %v1727_v17 = vsub.f32 0.0, %v1695_v22  ;;  %v3683_v15 = vpop.permute.xlu1 %930  ;;  %v606_v7 = vrot.slane %v3550_v62, %v3249_v38 }
 0x136   : > { %v3672_v0 = vpop.eup %2780  ;;  %v1065_v18 = vmul.f32 %v3663_v25, %v3655_v50  ;;  %v1453_v34 = vsel %vm552_vm7, %v1452_v23, %v1448_v49  ;;  %v3693_v23 = vadd.f32 %v3371_v21, %v3423_v41  ;;  %v798_v22 = vadd.f32 1.0, %v3608_v36  ;;  %v3702_v41 = vpop.permute.xlu0 %942 }
 0x137   : > { %v3678_v11 = vpop.eup %2782  ;;  %2798 = vrcp.f32 %v795_v20  ;;  %v1776_v49 = vmul.f32 1.442695, %v1724_v24  ;;  %v1726_v33 = vsub.f32 0.0, %v1694_v56  ;;  %v1782_v20 = vmul.f32 1.442695, %v1727_v17 }
 0x138   : > { %v3685_v9 = vpop.eup %2784  ;;  %4999 = vst [vmem:[#allocation79_spill] sm:$0xff] %v3693_v23  ;;  %1150 = vperm.xlu1 %2689, %v1065_v18   ;;  %2800 = vpow2.f32 %v2607_v1  ;;  %v615_v1 = vrot.slane %v3579_v55, %v3234_v27  ;;  %v2609_v43 = vmul.f32 -1.442695, %v3668_v54  ;;  %v1696_v24 = vand.u32 2147483647, %v3693_v23 }
 0x139   : > { %4998 = vst [vmem:[#allocation78_spill] sm:$0xff] %v3685_v9  ;;  %v2787_v29 = vpop.eup %2786  ;;  %2802 = vpow2.f32 %v1778_v47  ;;  %v3714_v56 = vadd.f32 %v3371_v21, %v3401_v46  ;;  %v1729_v47 = vsub.f32 0.0, %v1697_v2  ;;  %v620_v46 = vrot.slane %v3558_v14, %v3253_v40  ;;  %v5009_v14 = vld [vmem:[#allocation42_spill] sm:$0xff] }
 0x13a   : > { %v3698_v63 = vpop.eup %2788  ;;  %v1457_v62 = vrot.slane %v2787_v29, %v3293_v5  ;;  %v1064_v9 = vmul.f32 %v2787_v29, %v3683_v15  ;;  %2804 = vrcp.f32 %v798_v22  ;;  %v1780_v27 = vmul.f32 1.442695, %v1726_v33 }
 0x13b   : > { %5000 = vst [vmem:[#allocation80_spill] sm:$0xff] %v3698_v63  ;;  %v3704_v18 = vpop.eup %2790  ;;  %5002 = vst [vmem:[#allocation82_spill] sm:$0xff] %v3714_v56  ;;  %2806 = vpow2.f32 %v2606_v19  ;;  %v797_v19 = vadd.f32 1.0, %v3553_v12  ;;  %v1728_v22 = vsub.f32 0.0, %v1696_v24  ;;  %v1699_v55 = vand.u32 2147483647, %v3714_v56 }
 0x13c   : > { %v3709_v36 = vpop.eup %2792  ;;  %v3717_v29 = vsel %vm4933_vm8, %v1457_v62, %v1453_v34  ;;  %1147 = vperm.xlu0 %2688, %v1064_v9   ;;  %2808 = vpow2.f32 %v1776_v49  ;;  %v3729_v62 = vadd.f32 %v3371_v21, %v3439_v59  ;;  %v611_v34 = vsel %vm503_vm0, %v610_v31, %v606_v7  ;;  %v3736_v49 = vpop.permute.xlu1 %938  ;;  %v5007_v12 = vld [vmem:[#allocation37_spill] sm:$0xff] }
 0x13d   : > { %5001 = vst [vmem:[#allocation81_spill] sm:$0xff] %v3709_v36  ;;  %5003 = vst [vmem:[#allocation83_spill] sm:$0xff] %v3717_v29  ;;  %v1067_v17 = vmul.f32 %v3709_v36, %v3702_v41  ;;  %v3723_v63 = vpop.eup %2794  ;;  %2810 = vpow2.f32 %v1782_v20  ;;  %v2608_v9 = vmul.f32 -1.442695, %v3693_v23  ;;  %v616_v2 = vsel %vm510_vm1, %v615_v1, %v611_v34 }
 0x13e   : > { %5004 = vst [vmem:[#allocation84_spill] sm:$0xff] %v3723_v63  ;;  %5005 = vst [vmem:[#allocation85_spill] sm:$0xff] %v3729_v62  ;;  %2812 = vpow2.f32 %v2609_v43  ;;  %v3738_v33 = vpop.eup %2796  ;;  %v630_v59 = vrot.slane %v3594_v8, %v3269_v52  ;;  %v625_v31 = vrot.slane %v3623_v39, %v3272_v53  ;;  %v1786_v7 = vmul.f32 1.442695, %v1729_v47  ;;  %v5012_v63 = vld [vmem:[#allocation30_spill] sm:$0xff] }
 0x13f   : > { %1156 = vperm.xlu1 %2689, %v1067_v17   ;;  %2814 = vrcp.f32 %v797_v19  ;;  %v1698_v43 = vand.u32 2147483647, %v3729_v62  ;;  %v3749_v1 = vadd.f32 %v3371_v21, %v5007_v12  ;;  %v800_v24 = vadd.f32 1.0, %v3649_v10  ;;  %v3762_v12 = vpop.permute.xlu0 %950 }
 0x140   : > { %2816 = vpow2.f32 %v1780_v27  ;;  %v621_v34 = vsel %vm517_vm2, %v620_v46, %v616_v2  ;;  %v2611_v47 = vmul.f32 -1.442695, %v3714_v56  ;;  %v1784_v8 = vmul.f32 1.442695, %v1728_v22 }
 0x141   : > { %v3744_v20 = vpop.eup %2798  ;;  %5008 = vst [vmem:[#allocation37_spill] sm:$0xff] %v3749_v1  ;;  %2818 = vpow2.f32 %v2608_v9  ;;  %v1731_v27 = vsub.f32 0.0, %v1699_v55  ;;  %v3760_v39 = vadd.f32 %v3371_v21, %v5009_v14  ;;  %v565_v46 = vrot.slane %v3460_v57, %v5012_v63 }
 0x142   : > { %5006 = vst [vmem:[#allocation86_spill] sm:$0xff] %v3744_v20  ;;  %v3752_v17 = vpop.eup %2800  ;;  %v1066_v19 = vmul.f32 %v3744_v20, %v3736_v49  ;;  %2820 = vrcp.f32 %v800_v24  ;;  %v626_v9 = vsel %vm524_vm3, %v625_v31, %v621_v34  ;;  %v635_v2 = vrot.slane %v3645_v16, %v3284_v61 }
 0x143   : > { %5010 = vst [vmem:[#allocation42_spill] sm:$0xff] %v3760_v39  ;;  %v3764_v10 = vpop.eup %2802  ;;  %2822 = vpow2.f32 %v1786_v7  ;;  %v2610_v14 = vmul.f32 -1.442695, %v3729_v62  ;;  %v1730_v22 = vsub.f32 0.0, %v1698_v43  ;;  %v1701_v24 = vand.u32 2147483647, %v3749_v1 }
 0x144   : > { %5011 = vst [vmem:[#allocation87_spill] sm:$0xff] %v3764_v10  ;;  %1153 = vperm.xlu0 %2688, %v1066_v19   ;;  %v3771_v55 = vpop.eup %2804  ;;  %v799_v10 = vadd.f32 1.0, %v3588_v32  ;;  %v5014_v31 = vrot.slane %v3428_v45, %v3293_v5  ;;  %2824 = vpow2.f32 %v2611_v47  ;;  %v2613_v7 = vmul.f32 -1.442695, %v3749_v1 }
 0x145   : > { %5013 = vst [vmem:[#allocation30_spill] sm:$0xff] %v3771_v55  ;;  %v3776_v29 = vpop.eup %2806  ;;  %v1069_v19 = vmul.f32 %v3771_v55, %v3762_v12  ;;  %v631_v43 = vsel %vm531_vm4, %v630_v59, %v626_v9  ;;  %2826 = vpow2.f32 %v1784_v8  ;;  %v1790_v32 = vmul.f32 1.442695, %v1731_v27 }
 0x146   : > { %v560_v34 = vsel %vm4933_vm8, %v5014_v31, %v3681_v35  ;;  %v3786_v16 = vpop.eup %2808  ;;  %v1700_v20 = vand.u32 2147483647, %v3760_v39  ;;  %v640_v35 = vrot.slane %v3630_v51, %v3281_v60  ;;  %v636_v47 = vsel %vm538_vm5, %v635_v2, %v631_v43  ;;  %v3796_v31 = vpop.permute.xlu1 %946  ;;  %v5020_v2 = vld [vmem:[#allocation38_spill] sm:$0xff] }
 0x147   : > { %5015 = vst [vmem:[#allocation88_spill] sm:$0xff] %v3786_v16  ;;  %v3790_v61 = vpop.eup %2810  ;;  %v567_v52 = vsel %vm4931_vm9, %v565_v46, %v560_v34  ;;  %5017 = vst [vmem:[#allocation90_spill] sm:$0xff] %v3796_v31  ;;  %1162 = vperm.xlu1 %2689, %v1069_v19   ;;  %2828 = vrcp.f32 %v799_v10  ;;  %v645_v8 = vrot.slane %v3693_v23, %v3296_v6  ;;  %v1788_v59 = vmul.f32 1.442695, %v1730_v22  ;;  %v5019_v46 = vld [vmem:[#allocation32_spill] sm:$0xff]  ;;  %v3816_v23 = vpop.permute.xlu0 %961  ;;  %v5032_v6 = vld [vmem:[#allocation34_spill] sm:$0xff] }
 0x148   : > { %5016 = vst [vmem:[#allocation89_spill] sm:$0xff] %v3790_v61  ;;  %v3798_v16 = vpop.eup %2812  ;;  %2830 = vpow2.f32 %v2610_v14  ;;  %v1733_v27 = vsub.f32 0.0, %v1701_v24  ;;  %v579_v34 = vrot.slane %v3483_v37, %v5019_v46  ;;  %v3808_v43 = vadd.f32 %v3371_v21, %v5020_v2  ;;  %5023 = vst [vmem:[#allocation93_spill] sm:$0xff] %v3816_v23 }
 0x149   : > { %v3802_v9 = vpop.eup %2814  ;;  %2832 = vpow2.f32 %v2613_v7  ;;  %v802_v10 = vadd.f32 1.0, %v3678_v11  ;;  %v2612_v14 = vmul.f32 -1.442695, %v3760_v39  ;;  %v1732_v22 = vsub.f32 0.0, %v1700_v20 }
 0x14a   : > { %5018 = vst [vmem:[#allocation91_spill] sm:$0xff] %v3802_v9  ;;  %5021 = vst [vmem:[#allocation38_spill] sm:$0xff] %v3808_v43  ;;  %v3811_v19 = vpop.eup %2816  ;;  %2834 = vpow2.f32 %v1790_v32  ;;  %v1068_v24 = vmul.f32 %v3802_v9, %v3796_v31  ;;  %v5024_v7 = vrot.slane %v3444_v4, %v3305_v13  ;;  %v650_v11 = vrot.slane %v3668_v54, %v3293_v5 }
 0x14b   : > { %5022 = vst [vmem:[#allocation92_spill] sm:$0xff] %v3811_v19  ;;  %v3818_v51 = vpop.eup %2818  ;;  %v641_v32 = vsel %vm545_vm6, %v640_v35, %v636_v47  ;;  %2836 = vrcp.f32 %v802_v10  ;;  %v655_v61 = vrot.slane %v3729_v62, %v5012_v63  ;;  %v1794_v9 = vmul.f32 1.442695, %v1733_v27  ;;  %v5029_v10 = vld [vmem:[#allocation46_spill] sm:$0xff] }
 0x14c   : > { %v574_v2 = vsel %vm4932_vm10, %v5024_v7, %v567_v52  ;;  %v3827_v19 = vpop.eup %2820  ;;  %v646_v20 = vsel %vm552_vm7, %v645_v8, %v641_v32  ;;  %2838 = vpow2.f32 %v1788_v59  ;;  %1159 = vperm.xlu0 %2688, %v1068_v24   ;;  %v2615_v52 = vmul.f32 -1.442695, %v3808_v43  ;;  %v5026_v7 = vld [vmem:[#allocation48_spill] sm:$0xff]  ;;  %v5028_v8 = vld [vmem:[#allocation31_spill] sm:$0xff] }
 0x14d   : > { %v3832_v55 = vpop.eup %2822  ;;  %v3837_v54 = vadd.f32 %v3371_v21, %v5026_v7  ;;  %v1071_v35 = vmul.f32 %v3827_v19, %v3816_v23  ;;  %v801_v47 = vadd.f32 1.0, %v3633_v3  ;;  %v586_v32 = vrot.slane %v5029_v10, %v5028_v8  ;;  %v5033_v21 = vld [vmem:[#allocation55_spill] sm:$0xff]  ;;  %v3852_v23 = vpop.permute.xlu1 %954 }
 0x14e   : > { %5025 = vst [vmem:[#allocation94_spill] sm:$0xff] %v3832_v55  ;;  %v581_v59 = vsel %vm580_vm11, %v579_v34, %v574_v2  ;;  %2840 = vpow2.f32 %v2612_v14  ;;  %v1792_v27 = vmul.f32 1.442695, %v1732_v22  ;;  %v3845_v24 = vpop.eup %2824  ;;  %v593_v7 = vrot.slane %v5033_v21, %v5032_v6  ;;  %5034 = vst [vmem:[#allocation55_spill] sm:$0xff] %v3852_v23  ;;  %v5036_v22 = vld [vmem:[#allocation41_spill] sm:$0xff] }
 0x14f   : > { %5027 = vst [vmem:[#allocation48_spill] sm:$0xff] %v3837_v54  ;;  %v1703_v60 = vand.u32 2147483647, %v3808_v43  ;;  %1168 = vperm.xlu1 %2689, %v1071_v35   ;;  %2842 = vrcp.f32 %v801_v47  ;;  %v3854_v3 = vpop.eup %2826  ;;  %v660_v34 = vrot.slane %v3714_v56, %v3305_v13  ;;  %v651_v14 = vsel %vm4933_vm8, %v650_v11, %v646_v20  ;;  %v3876_v13 = vpop.permute.xlu0 %969 }
 0x150   : > { %5035 = vst [vmem:[#allocation95_spill] sm:$0xff] %v3854_v3  ;;  %2844 = vpow2.f32 %v1794_v9  ;;  %v1800_v2 = vadd.f32 1.0, %v5036_v22  ;;  %v656_v55 = vsel %vm4931_vm9, %v655_v61, %v651_v14  ;;  %v1702_v31 = vand.u32 2147483647, %v3837_v54 }
 0x151   : > { %v3860_v5 = vpop.eup %2828  ;;  %2846 = vpow2.f32 %v2615_v52  ;;  %v804_v35 = vadd.f32 1.0, %v3738_v33  ;;  %v588_v3 = vsel %vm4912_vm12, %v586_v32, %v581_v59  ;;  %v2614_v56 = vmul.f32 -1.442695, %v3837_v54  ;;  %v5039_v52 = vld [vmem:[#allocation40_spill] sm:$0xff] }
 0x152   : > { %5037 = vst [vmem:[#allocation41_spill] sm:$0xff] %v3860_v5  ;;  %v3865_v47 = vpop.eup %2830  ;;  %2848 = vpow2.f32 %v1792_v27  ;;  %v1070_v9 = vmul.f32 %v3860_v5, %v3852_v23  ;;  %v665_v61 = vrot.slane %v3760_v39, %v5019_v46  ;;  %v1735_v20 = vsub.f32 0.0, %v1703_v60  ;;  %5040 = vst [vmem:[#allocation40_spill] sm:$0xff] %v3876_v13  ;;  %v5043_v5 = vld [vmem:[#allocation49_spill] sm:$0xff] }
 0x153   : > { %v3871_v11 = vpop.eup %2832  ;;  %v1818_v14 = vadd.f32 1.0, %v5039_v52  ;;  %2850 = vrcp.f32 %v804_v35  ;;  %v3881_v32 = vsel %vm4906_vm13, %v593_v7, %v588_v3  ;;  %v670_v59 = vrot.slane %v3749_v1, %v5028_v8  ;;  %v5045_v3 = vld [vmem:[#allocation51_spill] sm:$0xff] }
 0x154   : > { %5038 = vst [vmem:[#allocation96_spill] sm:$0xff] %v3871_v11  ;;  %v3878_v33 = vpop.eup %2834  ;;  %5042 = vst [vmem:[#allocation98_spill] sm:$0xff] %v3881_v32  ;;  %v661_v27 = vsel %vm4932_vm10, %v660_v34, %v656_v55  ;;  %2852 = vlog2.f32 %v1800_v2  ;;  %1165 = vperm.xlu0 %2688, %v1070_v9   ;;  %v1734_v60 = vsub.f32 0.0, %v1702_v31  ;;  %v1803_v39 = vmul.f32 -0.5, %v5036_v22  ;;  %v3901_v9 = vpop.permute.xlu1 %965 }
 0x155   : > { %5041 = vst [vmem:[#allocation97_spill] sm:$0xff] %v3878_v33  ;;  %v3886_v23 = vpop.eup %2836  ;;  %v1836_v10 = vadd.f32 1.0, %v5043_v5  ;;  %v803_v35 = vadd.f32 1.0, %v3672_v0  ;;  %2854 = vpow2.f32 %v2614_v56  ;;  %v1854_v1 = vadd.f32 1.0, %v5045_v3  ;;  %5046 = vst [vmem:[#allocation51_spill] sm:$0xff] %v3901_v9  ;;  %v5047_v56 = vld [vmem:[#allocation53_spill] sm:$0xff] }
 0x156   : > { %v3891_v33 = vpop.eup %2838  ;;  %v1073_v55 = vmul.f32 %v3886_v23, %v3876_v13  ;;  %v666_v34 = vsel %vm580_vm11, %v665_v61, %v661_v27  ;;  %v1798_v31 = vmul.f32 1.442695, %v1735_v20  ;;  %v675_v2 = vrot.slane %v3837_v54, %v5032_v6  ;;  %v5049_v54 = vld [vmem:[#allocation54_spill] sm:$0xff] }
 0x157   : > { %5044 = vst [vmem:[#allocation49_spill] sm:$0xff] %v3891_v33  ;;  %2856 = vlog2.f32 %v1818_v14  ;;  %v1806_v33 = vand.u32 2147483647, %v5036_v22  ;;  %v1608_v7 = vmul.f32 %v5047_v56, %v3381_v30  ;;  %v1821_v43 = vmul.f32 -0.5, %v5039_v52 }
 0x158   : > { %v3903_v0 = vpop.eup %2840  ;;  %1174 = vperm.xlu1 %2689, %v1073_v55   ;;  %2858 = vrcp.f32 %v803_v35  ;;  %v1796_v61 = vmul.f32 1.442695, %v1734_v60  ;;  %v1804_v20 = vadd.f32 1.0, %v1803_v39  ;;  %v806_v14 = vadd.f32 1.0, %v3776_v29  ;;  %v3924_v29 = vpop.permute.xlu0 %977 }
 0x159   : > { %v3909_v13 = vpop.eup %2842  ;;  %2860 = vlog2.f32 %v1836_v10  ;;  %v1610_v62 = vmul.f32 %v5049_v54, %v3376_v28  ;;  %v1839_v32 = vmul.f32 -0.5, %v5043_v5  ;;  %v671_v35 = vsel %vm4912_vm12, %v670_v59, %v666_v34  ;;  %v5051_v10 = vld [vmem:[#allocation47_spill] sm:$0xff] }
 0x15a   : > { %v3912_v27 = vpop.eup %2844  ;;  %2862 = vlog2.f32 %v1854_v1  ;;  %v1072_v56 = vmul.f32 %v3909_v13, %v3901_v9  ;;  %v1824_v39 = vand.u32 2147483647, %v5039_v52  ;;  %v1845_v60 = vadd.f32 1.0, %v5051_v10  ;;  %5052 = vst [vmem:[#allocation47_spill] sm:$0xff] %v3924_v29 }
 0x15b   : > { %5048 = vst [vmem:[#allocation53_spill] sm:$0xff] %v3912_v27  ;;  %v3919_v55 = vpop.eup %2846  ;;  %2864 = vrcp.f32 %v806_v14  ;;  %v3929_v54 = vsel %vm4906_vm13, %v675_v2, %v671_v35  ;;  %vm3931_vm14 = vcmp.lt.f32.partialorder %v1806_v33, 0.0004427343  ;;  %v1822_v9 = vadd.f32 1.0, %v1821_v43 }
 0x15c   : > { %5050 = vst [vmem:[#allocation54_spill] sm:$0xff] %v3919_v55  ;;  %v3926_v27 = vpop.eup %2848  ;;  %2866 = vpow2.f32 %v1798_v31  ;;  %5054 = vst [vmem:[#allocation100_spill] sm:$0xff] %v3929_v54  ;;  %1171 = vperm.xlu0 %2688, %v1072_v56   ;;  %v1805_v34 = vmul.f32 %v5036_v22, %v1804_v20  ;;  %v5058_v8 = vmax.f32 %v3381_v30, 0.0  ;;  %v5059_v2 = vmax.f32 %v3376_v28, 0.0  ;;  %v5062_v22 = vld [vmem:[#allocation35_spill] sm:$0xff]  ;;  %v3981_v36 = vpop.permute.xlu0 %985 }
 0x15d   : > { %5053 = vst [vmem:[#allocation99_spill] sm:$0xff] %v3926_v27  ;;  %v3935_v59 = vpop.eup %2850  ;;  %2868 = vpow2.f32 %v1796_v61  ;;  %v1842_v27 = vand.u32 2147483647, %v5043_v5  ;;  %v1840_v33 = vadd.f32 1.0, %v1839_v32  ;;  %v1612_v54 = vmul.f32 %v3533_v44, %v3404_v48  ;;  %v5063_v30 = vld [vmem:[#allocation59_spill] sm:$0xff]  ;;  %5068 = vst [vmem:[#allocation35_spill] sm:$0xff] %v3981_v36 }
 0x15e   : > { %5057 = vst [vmem:[#allocation101_spill] sm:$0xff] %v3935_v59  ;;  %v1640_v14 = vsub.f32 %v5058_v8, %v1608_v7  ;;  %v2853_v31 = vpop.eup %2852  ;;  %v1642_v35 = vsub.f32 %v5059_v2, %v1610_v62  ;;  %v1075_v43 = vmul.f32 %v3935_v59, %v3924_v29  ;;  %vm3947_vm15 = vcmp.lt.f32.partialorder %v1824_v39, 0.0004427343  ;;  %v3962_v39 = vpop.permute.xlu1 %973 }
 0x15f   : > { %v1611_v8 = vmul.f32 %v5063_v30, %v5062_v22  ;;  %v1857_v7 = vmul.f32 -0.5, %v5045_v3  ;;  %2870 = vlog2.f32 %v1845_v60  ;;  %v805_v28 = vadd.f32 1.0, %v3704_v18  ;;  %v3955_v62 = vpop.eup %2854  ;;  %v5079_v60 = vld [vmem:[#allocation69_spill] sm:$0xff] }
 0x160   : > { %v1823_v32 = vmul.f32 %v5039_v52, %v1822_v9  ;;  %v1579_v44 = vmax.f32 %v5062_v22, 0.0  ;;  %v1860_v20 = vand.u32 2147483647, %v5045_v3  ;;  %v1614_v56 = vmul.f32 %v3566_v58, %v3415_v26  ;;  %1180 = vperm.xlu1 %2689, %v1075_v43   ;;  %v5067_v58 = vld [vmem:[#allocation57_spill] sm:$0xff] }
 0x161   : > { %v2857_v2 = vpop.eup %2856  ;;  %v1802_v30 = vmul.f32 0.6931472, %v2853_v31  ;;  %vm3964_vm13 = vcmp.lt.f32.partialorder %v1842_v27, 0.0004427343  ;;  %v1848_v18 = vmul.f32 -0.5, %v5051_v10  ;;  %2872 = vrcp.f32 %v805_v28 }
 0x162   : > { %v3969_v52 = vpop.eup %2858  ;;  %v5066_v9 = vmax.f32 %v3404_v48, 0.0  ;;  %v1582_v29 = vmax.f32 %v3415_v26, 0.0  ;;  %v1872_v6 = vadd.f32 1.0, %v5067_v58  ;;  %v808_v43 = vadd.f32 1.0, %v3818_v51 }
 0x163   : > { %v2861_v55 = vpop.eup %2860  ;;  %v1841_v27 = vmul.f32 %v5043_v5, %v1840_v33  ;;  %v3977_v31 = vsub.f32 %v1579_v44, %v1611_v8  ;;  %v1858_v11 = vadd.f32 1.0, %v1857_v7  ;;  %v1074_v28 = vmul.f32 %v3969_v52, %v3962_v39 }
 0x164   : > { %v1644_v22 = vsub.f32 %v5066_v9, %v1612_v54  ;;  %v2863_v46 = vpop.eup %2862  ;;  %v1820_v48 = vmul.f32 0.6931472, %v2857_v2  ;;  %vm3983_vm12 = vcmp.lt.f32.partialorder %v1860_v20, 0.0004427343  ;;  %v1646_v26 = vsub.f32 %v1582_v29, %v1614_v56  ;;  %v5071_v9 = vld [vmem:[#allocation50_spill] sm:$0xff] }
 0x165   : > { %v1863_v51 = vadd.f32 1.0, %v5071_v9  ;;  %v3988_v59 = vpop.eup %2864  ;;  %v1808_v5 = vsel %vm3931_vm14, %v1805_v34, %v1802_v30  ;;  %v1849_v33 = vadd.f32 1.0, %v1848_v18  ;;  %v1851_v8 = vand.u32 2147483647, %v5051_v10  ;;  %1177 = vperm.xlu0 %2688, %v1074_v28   ;;  %v5074_v30 = vld [vmem:[#allocation63_spill] sm:$0xff] }
 0x166   : > { %2874 = vrcp.f32 %v808_v43  ;;  %v3993_v7 = vpop.eup %2866  ;;  %v1838_v44 = vmul.f32 0.6931472, %v2861_v55  ;;  %v1875_v20 = vmul.f32 -0.5, %v5067_v58  ;;  %v1077_v29 = vmul.f32 %v3988_v59, %v3981_v36 }
 0x167   : > { %5072 = vst [vmem:[#allocation59_spill] sm:$0xff] %v3993_v7  ;;  %2876 = vlog2.f32 %v1872_v6  ;;  %v3998_v56 = vpop.eup %2868  ;;  %v4000_v2 = vadd.f32 %v1808_v5, %v1640_v14  ;;  %v1859_v1 = vmul.f32 %v5045_v3, %v1858_v11  ;;  %v1581_v34 = vmax.f32 %v3397_v42, 0.0  ;;  %v5077_v3 = vld [vmem:[#allocation64_spill] sm:$0xff] }
 0x168   : > { %5073 = vst [vmem:[#allocation57_spill] sm:$0xff] %v3998_v56  ;;  %v1613_v18 = vmul.f32 %v5074_v30, %v3397_v42  ;;  %v1826_v55 = vsel %vm3947_vm15, %v1823_v32, %v1820_v48  ;;  %v1856_v6 = vmul.f32 0.6931472, %v2863_v46  ;;  %2878 = vlog2.f32 %v1863_v51  ;;  %1186 = vperm.xlu1 %2689, %v1077_v29   ;;  %v4017_v42 = vpop.permute.xlu1 %981  ;;  %v5078_v48 = vld [vmem:[#allocation39_spill] sm:$0xff]  ;;  %v5088_v11 = vld [vmem:[#allocation68_spill] sm:$0xff] }
 0x169   : > { %v807_v43 = vadd.f32 1.0, %v3752_v17  ;;  %v2871_v28 = vpop.eup %2870  ;;  %v4009_v7 = vadd.f32 %v1826_v55, %v1642_v35  ;;  %v1850_v14 = vmul.f32 %v5051_v10, %v1849_v33  ;;  %vm4012_vm14 = vcmp.lt.f32.partialorder %v1851_v8, 0.0004427343 }
 0x16a   : > { %v1890_v5 = vadd.f32 1.0, %v5077_v3  ;;  %v1844_v46 = vsel %vm3964_vm13, %v1841_v27, %v1838_v44  ;;  %v1876_v61 = vadd.f32 1.0, %v1875_v20  ;;  %v1878_v32 = vand.u32 2147483647, %v5067_v58 }
 0x16b   : > { %2880 = vrcp.f32 %v807_v43  ;;  %v4022_v17 = vpop.eup %2872  ;;  %v4024_v35 = vadd.f32 %v1844_v46, %v1644_v22  ;;  %v1645_v10 = vsub.f32 %v1581_v34, %v1613_v18  ;;  %v1584_v51 = vmax.f32 %v5078_v48, 0.0  ;;  %v5080_v22 = vld [vmem:[#allocation56_spill] sm:$0xff]  ;;  %v4036_v34 = vpop.permute.xlu0 %993  ;;  %v5085_v46 = vld [vmem:[#allocation73_spill] sm:$0xff] }
 0x16c   : > { %v1866_v33 = vmul.f32 -0.5, %v5071_v9  ;;  %v1862_v8 = vsel %vm3983_vm12, %v1859_v1, %v1856_v6  ;;  %v1847_v29 = vmul.f32 0.6931472, %v2871_v28  ;;  %v1616_v27 = vmul.f32 %v5079_v60, %v5078_v48  ;;  %5081 = vst [vmem:[#allocation50_spill] sm:$0xff] %v4036_v34  ;;  %v5084_v6 = vld [vmem:[#allocation36_spill] sm:$0xff] }
 0x16d   : > { %v1076_v44 = vmul.f32 %v4022_v17, %v4017_v42  ;;  %v1869_v20 = vand.u32 2147483647, %v5071_v9  ;;  %2882 = vlog2.f32 %v1890_v5  ;;  %v1881_v30 = vadd.f32 1.0, %v5080_v22 }
 0x16e   : > { %v810_v18 = vadd.f32 1.0, %v3865_v47  ;;  %v4039_v55 = vadd.f32 %v1862_v8, %v1646_v26  ;;  %v1877_v54 = vmul.f32 %v5067_v58, %v1876_v61  ;;  %vm4042_vm12 = vcmp.lt.f32.partialorder %v1878_v32, 0.0004427343 }
 0x16f   : > { %v1583_v43 = vmax.f32 %v5084_v6, 0.0  ;;  %1183 = vperm.xlu0 %2688, %v1076_v44   ;;  %v1867_v5 = vadd.f32 1.0, %v1866_v33  ;;  %v1615_v48 = vmul.f32 %v5085_v46, %v5084_v6  ;;  %v1893_v60 = vmul.f32 -0.5, %v5077_v3 }
 0x170   : > { %v4047_v28 = vpop.eup %2874  ;;  %2884 = vrcp.f32 %v810_v18  ;;  %v1853_v58 = vsel %vm4012_vm14, %v1850_v14, %v1847_v29  ;;  %v1648_v26 = vsub.f32 %v1584_v51, %v1616_v27  ;;  %v1884_v61 = vmul.f32 -0.5, %v5080_v22  ;;  %v4068_v29 = vpop.permute.xlu1 %989 }
 0x171   : > { %v2877_v47 = vpop.eup %2876  ;;  %v1079_v32 = vmul.f32 %v4047_v28, %v4036_v34  ;;  %v4057_v8 = vadd.f32 %v1853_v58, %v1645_v10  ;;  %vm4059_vm13 = vcmp.lt.f32.partialorder %v1869_v20, 0.0004427343  ;;  %v1586_v44 = vmax.f32 %v3460_v57, 0.0 }
 0x172   : > { %2886 = vlog2.f32 %v1881_v30  ;;  %v2879_v18 = vpop.eup %2878  ;;  %v1896_v6 = vand.u32 2147483647, %v5077_v3  ;;  %v1618_v14 = vmul.f32 %v3655_v50, %v3460_v57  ;;  %v1908_v51 = vadd.f32 1.0, %v5088_v11 }
 0x173   : > { %1192 = vperm.xlu1 %2689, %v1079_v32   ;;  %v809_v10 = vadd.f32 1.0, %v3798_v16  ;;  %v1874_v27 = vmul.f32 0.6931472, %v2877_v47  ;;  %v1868_v20 = vmul.f32 %v5071_v9, %v1867_v5  ;;  %v1647_v46 = vsub.f32 %v1583_v43, %v1615_v48  ;;  %v4090_v47 = vpop.permute.xlu0 %1001 }
 0x174   : > { %v1894_v58 = vadd.f32 1.0, %v1893_v60  ;;  %v1885_v30 = vadd.f32 1.0, %v1884_v61  ;;  %v1617_v34 = vmul.f32 %v3683_v15, %v3428_v45  ;;  %v812_v57 = vadd.f32 1.0, %v3903_v0 }
 0x175   : > { %v4072_v56 = vpop.eup %2880  ;;  %2888 = vrcp.f32 %v809_v10  ;;  %v1865_v50 = vmul.f32 0.6931472, %v2879_v18  ;;  %v1887_v36 = vand.u32 2147483647, %v5080_v22  ;;  %v1911_v32 = vmul.f32 -0.5, %v5088_v11 }
 0x176   : > { %v1078_v16 = vmul.f32 %v4072_v56, %v4068_v29  ;;  %vm4081_vm15 = vcmp.lt.f32.partialorder %v1896_v6, 0.0004427343  ;;  %v1650_v43 = vsub.f32 %v1586_v44, %v1618_v14  ;;  %v1585_v5 = vmax.f32 %v3428_v45, 0.0 }
 0x177   : > { %2890 = vlog2.f32 %v1908_v51  ;;  %v2883_v15 = vpop.eup %2882  ;;  %v1880_v0 = vsel %vm4042_vm12, %v1877_v54, %v1874_v27  ;;  %v1895_v48 = vmul.f32 %v5077_v3, %v1894_v58  ;;  %v1588_v60 = vmax.f32 %v3483_v37, 0.0  ;;  %v5103_v3 = vld [vmem:[#allocation23_spill] sm:$0xff] }
 0x178   : > { %1189 = vperm.xlu0 %2688, %v1078_v16   ;;  %2892 = vrcp.f32 %v812_v57  ;;  %v4092_v61 = vadd.f32 %v1880_v0, %v1648_v26  ;;  %v1886_v18 = vmul.f32 %v5080_v22, %v1885_v30  ;;  %v1649_v44 = vsub.f32 %v1585_v5, %v1617_v34  ;;  %v5093_v26 = vld [vmem:[#allocation60_spill] sm:$0xff]  ;;  %v5094_v57 = vld [vmem:[#allocation22_spill] sm:$0xff] }
 0x179   : > { %v1620_v45 = vmul.f32 %v3702_v41, %v3483_v37  ;;  %v1871_v54 = vsel %vm4059_vm13, %v1868_v20, %v1865_v50  ;;  %vm4101_vm14 = vcmp.lt.f32.partialorder %v1887_v36, 0.0004427343  ;;  %v1912_v1 = vadd.f32 1.0, %v1911_v32  ;;  %v4122_v32 = vpop.permute.xlu1 %997 }
 0x17a   : > { %v4097_v6 = vpop.eup %2884  ;;  %v1914_v14 = vand.u32 2147483647, %v5088_v11  ;;  %v1899_v51 = vadd.f32 1.0, %v5093_v26  ;;  %v1892_v10 = vmul.f32 0.6931472, %v2883_v15  ;;  %v1902_v22 = vmul.f32 -0.5, %v5093_v26 }
 0x17b   : > { %v1081_v37 = vmul.f32 %v4097_v6, %v4090_v47  ;;  %v811_v41 = vadd.f32 1.0, %v3845_v24  ;;  %v4111_v33 = vadd.f32 %v1871_v54, %v1647_v46  ;;  %v1587_v27 = vmax.f32 %v3444_v4, 0.0  ;;  %v5095_v46 = vld [vmem:[#allocation19_spill] sm:$0xff]  ;;  %v4144_v54 = vpop.permute.xlu0 %1009 }
 0x17c   : > { %v2887_v34 = vpop.eup %2886  ;;  %v1619_v20 = vmul.f32 %v3736_v49, %v3444_v4  ;;  %v1652_v58 = vsub.f32 %v1588_v60, %v1620_v45  ;;  %v1492_v30 = vrot.slane %v3827_v19, %v3249_v38  ;;  %v1496_v50 = vrot.slane %v3909_v13, %v5094_v57  ;;  %5099 = vst [vmem:[#allocation63_spill] sm:$0xff] %v4144_v54  ;;  %v5134_v57 = vld [vmem:[#allocation80_spill] sm:$0xff] }
 0x17d   : > { %1198 = vperm.xlu1 %2689, %v1081_v37   ;;  %2894 = vrcp.f32 %v811_v41  ;;  %v1913_v24 = vmul.f32 %v5088_v11, %v1912_v1  ;;  %v1501_v16 = vrot.slane %v3886_v23, %v5095_v46  ;;  %v814_v5 = vadd.f32 1.0, %v3955_v62  ;;  %v5098_v23 = vld [vmem:[#allocation74_spill] sm:$0xff]  ;;  %v5132_v46 = vld [vmem:[#allocation91_spill] sm:$0xff] }
 0x17e   : > { %2896 = vlog2.f32 %v1899_v51  ;;  %v1898_v49 = vsel %vm4081_vm15, %v1895_v48, %v1892_v10  ;;  %v1883_v19 = vmul.f32 0.6931472, %v2887_v34  ;;  %vm4132_vm12 = vcmp.lt.f32.partialorder %v1914_v14, 0.0004427343 }
 0x17f   : > { %v4128_v4 = vpop.eup %2888  ;;  %v1903_v15 = vadd.f32 1.0, %v1902_v22  ;;  %v1905_v0 = vand.u32 2147483647, %v5093_v26  ;;  %v4137_v11 = vadd.f32 %v1898_v49, %v1650_v43  ;;  %v4139_v60 = vsub.f32 %v1587_v27, %v1619_v20  ;;  %v5100_v22 = vld [vmem:[#allocation101_spill] sm:$0xff]  ;;  %v5101_v27 = vld [vmem:[#allocation32_spill] sm:$0xff]  ;;  %v4206_v13 = vpop.permute.xlu0 %1017 }
 0x180   : > { %v1926_v45 = vadd.f32 1.0, %v5098_v23  ;;  %v1080_v62 = vmul.f32 %v4128_v4, %v4122_v32  ;;  %v1929_v48 = vmul.f32 -0.5, %v5098_v23  ;;  %v1497_v1 = vsel %vm503_vm0, %v1496_v50, %v1492_v30  ;;  %v5102_v20 = vld [vmem:[#allocation81_spill] sm:$0xff]  ;;  %5117 = vst [vmem:[#allocation36_spill] sm:$0xff] %v4206_v13 }
 0x181   : > { %v2891_v9 = vpop.eup %2890  ;;  %v1506_v14 = vrot.slane %v3969_v52, %v3253_v40  ;;  %2898 = vrcp.f32 %v814_v5  ;;  %v1590_v51 = vmax.f32 %v5033_v21, 0.0  ;;  %v1622_v10 = vmul.f32 %v3762_v12, %v5033_v21  ;;  %v5113_v21 = vld [vmem:[#allocation90_spill] sm:$0xff] }
 0x182   : > { %v4150_v43 = vpop.eup %2892  ;;  %v1511_v37 = vrot.slane %v5100_v22, %v3272_v53  ;;  %v1502_v41 = vsel %vm510_vm1, %v1501_v16, %v1497_v1  ;;  %1195 = vperm.xlu0 %2688, %v1080_v62   ;;  %v1889_v34 = vsel %vm4101_vm14, %v1886_v18, %v1883_v19  ;;  %v4163_v30 = vmul.f32 %v5093_v26, %v1903_v15  ;;  %v4173_v19 = vpop.permute.xlu1 %1005  ;;  %v5105_v26 = vld [vmem:[#allocation96_spill] sm:$0xff]  ;;  %v5110_v1 = vld [vmem:[#allocation26_spill] sm:$0xff] }
 0x183   : > { %v1083_v50 = vmul.f32 %v4150_v43, %v4144_v54  ;;  %v4167_v5 = vadd.f32 %v1889_v34, %v1649_v44  ;;  %v1910_v12 = vmul.f32 0.6931472, %v2891_v9  ;;  %2900 = vlog2.f32 %v1926_v45  ;;  %5104 = vst [vmem:[#allocation64_spill] sm:$0xff] %v4173_v19  ;;  %v5109_v45 = vld [vmem:[#allocation46_spill] sm:$0xff]  ;;  %v5136_v54 = vld [vmem:[#allocation52_spill] sm:$0xff] }
 0x184   : > { %v1930_v16 = vadd.f32 1.0, %v1929_v48  ;;  %v1507_v49 = vsel %vm517_vm2, %v1506_v14, %v1502_v41  ;;  %v1516_v18 = vrot.slane %v4022_v17, %v5103_v3  ;;  %v813_v15 = vadd.f32 1.0, %v5105_v26  ;;  %v5111_v17 = vld [vmem:[#allocation67_spill] sm:$0xff] }
 0x185   : > { %1204 = vperm.xlu1 %2689, %v1083_v50   ;;  %vm4176_vm13 = vcmp.lt.f32.partialorder %v1905_v0, 0.0004427343  ;;  %v4180_v44 = vsub.f32 %v1590_v51, %v1622_v10  ;;  %v1589_v9 = vmax.f32 %v5109_v45, 0.0  ;;  %v1521_v48 = vrot.slane %v3988_v59, %v5110_v1  ;;  %v5112_v0 = vld [vmem:[#allocation54_spill] sm:$0xff]  ;;  %v5120_v1 = vld [vmem:[#allocation28_spill] sm:$0xff] }
 0x186   : > { %v1512_v14 = vsel %vm524_vm3, %v1511_v37, %v1507_v49  ;;  %v1917_v41 = vadd.f32 1.0, %v5111_v17  ;;  %v1920_v34 = vmul.f32 -0.5, %v5111_v17  ;;  %2902 = vrcp.f32 %v813_v15 }
 0x187   : > { %5108 = vst [vmem:[#allocation39_spill] sm:$0xff] %v4180_v44  ;;  %v4186_v22 = vpop.eup %2894  ;;  %v815_v50 = vadd.f32 1.0, %v5112_v0  ;;  %v1916_v51 = vsel %vm4132_vm12, %v1913_v24, %v1910_v12  ;;  %v1621_v59 = vmul.f32 %v5113_v21, %v5109_v45  ;;  %v4201_v52 = vmul.f32 %v5098_v23, %v1930_v16  ;;  %v5116_v0 = vld [vmem:[#allocation25_spill] sm:$0xff]  ;;  %v5119_v12 = vld [vmem:[#allocation86_spill] sm:$0xff] }
 0x188   : > { %v2897_v26 = vpop.eup %2896  ;;  %v1082_v37 = vmul.f32 %v4186_v22, %v4173_v19  ;;  %v4198_v49 = vadd.f32 %v1916_v51, %v1652_v58  ;;  %v1517_v15 = vsel %vm531_vm4, %v1516_v18, %v1512_v14  ;;  %v1526_v36 = vrot.slane %v4072_v56, %v5116_v0  ;;  %v5118_v24 = vld [vmem:[#allocation29_spill] sm:$0xff]  ;;  %v5121_v18 = vld [vmem:[#allocation78_spill] sm:$0xff]  ;;  %v5122_v56 = vld [vmem:[#allocation44_spill] sm:$0xff] }
 0x189   : > { %5115 = vst [vmem:[#allocation56_spill] sm:$0xff] %v4201_v52  ;;  %v1467_v10 = vrot.slane %v5119_v12, %v5118_v24  ;;  %v1531_v21 = vrot.slane %v4047_v28, %v5120_v1  ;;  %v1522_v45 = vsel %vm538_vm5, %v1521_v48, %v1517_v15  ;;  %2904 = vrcp.f32 %v815_v50  ;;  %v5124_v12 = vld [vmem:[#allocation61_spill] sm:$0xff]  ;;  %v4226_v48 = vpop.permute.xlu1 %1013  ;;  %v5128_v1 = vld [vmem:[#allocation43_spill] sm:$0xff]  ;;  %v5140_v52 = vld [vmem:[#allocation38_spill] sm:$0xff] }
 0x18a   : > { %5114 = vst [vmem:[#allocation69_spill] sm:$0xff] %v4198_v49  ;;  %1201 = vperm.xlu0 %2688, %v1082_v37   ;;  %v4215_v16 = vmul.f32 0.6931472, %v2897_v26  ;;  %2906 = vlog2.f32 %v1917_v41  ;;  %v1944_v14 = vadd.f32 1.0, %v5121_v18  ;;  %v1809_v51 = vadd.f32 1.0, %v5122_v56  ;;  %5125 = vst [vmem:[#allocation68_spill] sm:$0xff] %v4226_v48 }
 0x18b   : > { %v4213_v58 = vpop.eup %2898  ;;  %v4219_v0 = vadd.f32 1.0, %v1920_v34  ;;  %v4221_v3 = vsub.f32 %v1589_v9, %v1621_v59  ;;  %v1947_v50 = vmul.f32 -0.5, %v5121_v18  ;;  %v1527_v41 = vsel %vm545_vm6, %v1526_v36, %v1522_v45  ;;  %v5126_v37 = vld [vmem:[#allocation27_spill] sm:$0xff]  ;;  %v5127_v9 = vld [vmem:[#allocation93_spill] sm:$0xff]  ;;  %v5129_v45 = vld [vmem:[#allocation34_spill] sm:$0xff] }
 0x18c   : > { %v1085_v28 = vmul.f32 %v4213_v58, %v4206_v13  ;;  %v1536_v15 = vrot.slane %v4128_v4, %v5126_v37  ;;  %v4237_v59 = vmul.f32 %v5127_v9, %v5124_v12  ;;  %v1532_v53 = vsel %vm552_vm7, %v1531_v21, %v1527_v41  ;;  %v5130_v26 = vld [vmem:[#allocation30_spill] sm:$0xff]  ;;  %v5131_v37 = vld [vmem:[#allocation31_spill] sm:$0xff] }
 0x18d   : > { %5123 = vst [vmem:[#allocation73_spill] sm:$0xff] %v4221_v3  ;;  %v4233_v34 = vpop.eup %2900  ;;  %2908 = vlog2.f32 %v1809_v51  ;;  %v1827_v40 = vadd.f32 1.0, %v5128_v1  ;;  %v1482_v4 = vrot.slane %v5130_v26, %v5129_v45  ;;  %v1477_v38 = vrot.slane %v5132_v46, %v5131_v37  ;;  %v5139_v3 = vld [vmem:[#allocation100_spill] sm:$0xff]  ;;  %v5142_v19 = vld [vmem:[#allocation83_spill] sm:$0xff] }
 0x18e   : > { %1210 = vperm.xlu1 %2689, %v1085_v28   ;;  %2910 = vlog2.f32 %v1944_v14  ;;  %v1541_v9 = vrot.slane %v4097_v6, %v5012_v63  ;;  %v1812_v21 = vmul.f32 -0.5, %v5122_v56  ;;  %vm601_vm15 = vcmask 1048512   ;;  %v5133_v28 = vld [vmem:[#allocation76_spill] sm:$0xff] }
 0x18f   : > { %2912 = vlog2.f32 %v1827_v40  ;;  %v1953_v41 = vadd.f32 1.0, %v5133_v28  ;;  %v1971_v13 = vadd.f32 1.0, %v5134_v57  ;;  %v1537_v36 = vsel %vm4933_vm8, %v1536_v15, %v1532_v53  ;;  %v4262_v40 = vpop.permute.xlu1 %1021  ;;  %v5135_v15 = vld [vmem:[#allocation98_spill] sm:$0xff] }
 0x190   : > { %v2903_v51 = vpop.eup %2902  ;;  %v1546_v26 = vrot.slane %v4186_v22, %v5118_v24  ;;  %v1551_v46 = vrot.slane %v4150_v43, %v5101_v27  ;;  %v1561_v6 = vrot.slane %v4213_v58, %v5129_v45  ;;  %v1830_v44 = vmul.f32 -0.5, %v5128_v1  ;;  %v5137_v22 = vld [vmem:[#allocation33_spill] sm:$0xff] }
 0x191   : > { %v1084_v14 = vmul.f32 %v2903_v51, %v4226_v48  ;;  %v1556_v53 = vrot.slane %v2903_v51, %v5131_v37  ;;  %v5138_v24 = vrot.slane %v5136_v54, %v5137_v22  ;;  %v5141_v58 = vrot.slane %v5140_v52, %v5137_v22 }
 0x192   : > { %2153 = vperm.xlu1 %2689, %v4000_v2   ;;  %vm682_vm14 = vcmask 1041409   ;;  %v1813_v2 = vadd.f32 1.0, %v1812_v21  ;;  %v5143_v51 = vrot.slane %v3663_v25, %v5012_v63  ;;  %2914 = vlog2.f32 %v1953_v41 }
 0x193   : > { %v602_v43 = vsel %vm601_vm15, %v5138_v24, %v5135_v15  ;;  %v681_v45 = vsel %vm601_vm15, %v5141_v58, %v5139_v3  ;;  %v2905_v48 = vpop.eup %2904  ;;  %1207 = vperm.xlu0 %2688, %v1084_v14   ;;  %v1542_v24 = vsel %vm4931_vm9, %v1541_v9, %v1537_v36  ;;  %v5144_v14 = vld [vmem:[#allocation41_spill] sm:$0xff]  ;;  %v5145_v25 = vrot.slane %v5102_v20, %v5101_v27 }
 0x194   : > { %v683_v49 = vsel %vm682_vm14, %v681_v45, %v602_v43  ;;  %v1463_v37 = vsel %vm4931_vm9, %v5143_v51, %v5142_v19  ;;  %v4284_v15 = vpop.eup %2906  ;;  %v1086_v52 = vmul.f32 %v2905_v48, %v4262_v40  ;;  %v1487_v21 = vrot.slane %v5144_v14, %v5137_v22  ;;  %v1377_v58 = vld [vmem:[#allocation3] sm:$0x3] }
 0x195   : > { %685 = vst [vmem:[%s3194_s24] sm:$0x3] %v683_v49  ;;  %v1468_v3 = vsel %vm4932_vm10, %v1467_v10, %v1463_v37  ;;  %v1547_v45 = vsel %vm4932_vm10, %v1546_v26, %v1542_v24  ;;  %v1815_v43 = vand.u32 2147483647, %v5122_v56  ;;  %v1948_v49 = vadd.f32 1.0, %v1947_v50 }
 0x196   : > { %2159 = vperm.xlu1 %2689, %v4009_v7   ;;  %v1473_v19 = vsel %vm580_vm11, %v5145_v25, %v1468_v3  ;;  %v1552_v36 = vsel %vm580_vm11, %v1551_v46, %v1547_v45  ;;  %vm5146_vm12 = vcmask 917312   ;;  %v1566_v9 = vrot.slane %v2905_v48, %v5137_v22  ;;  %v5150_v3 = vld [vmem:[#allocation87_spill] sm:$0xff] }
 0x197   : > { %v1478_v10 = vsel %vm5146_vm12, %v1477_v38, %v1473_v19  ;;  %vm5147_vm9 = vmmov %vm5146_vm12  ;;  %v2909_v26 = vpop.eup %2908  ;;  %2916 = vlog2.f32 %v1971_v13  ;;  %1213 = vperm.xlu0 %2688, %v1086_v52   ;;  %v1831_v41 = vadd.f32 1.0, %v1830_v44  ;;  %vm5148_vm10 = vcmask 982912   ;;  %v5151_v13 = vld [vmem:[#allocation84_spill] sm:$0xff] }
 0x198   : > { %v1557_v37 = vsel %vm5147_vm9, %v1556_v53, %v1552_v36  ;;  %v1483_v7 = vsel %vm5148_vm10, %v1482_v4, %v1478_v10  ;;  %vm5149_vm8 = vmmov %vm5148_vm10  ;;  %v2911_v51 = vpop.eup %2910  ;;  %v1811_v24 = vmul.f32 0.6931472, %v2909_v26  ;;  %v1814_v46 = vmul.f32 %v5122_v56, %v1813_v2  ;;  %v5160_v26 = vld [vmem:[#allocation65_spill] sm:$0xff] }
 0x199   : > { %v1562_v20 = vsel %vm5149_vm8, %v1561_v6, %v1557_v37  ;;  %v1488_v50 = vsel %vm601_vm15, %v1487_v21, %v1483_v7  ;;  %v2913_v53 = vpop.eup %2912  ;;  %v1989_v48 = vadd.f32 1.0, %v5150_v3  ;;  %vm1816_vm9 = vcmp.lt.f32.partialorder %v1815_v43, 0.0004427343  ;;  %v5153_v43 = vld [vmem:[#allocation45_spill] sm:$0xff] }
 0x19a   : > { %v1567_v38 = vsel %vm601_vm15, %v1566_v9, %v1562_v20  ;;  %v1833_v52 = vand.u32 2147483647, %v5128_v1  ;;  %2165 = vperm.xlu1 %2689, %v4024_v35   ;;  %v1965_v4 = vmul.f32 -0.5, %v5151_v13  ;;  %v1817_v6 = vsel %vm1816_vm9, %v1814_v46, %v1811_v24 }
 0x19b   : > { %v1568_v44 = vsel %vm682_vm14, %v1567_v38, %v1488_v50  ;;  %v1829_v14 = vmul.f32 0.6931472, %v2913_v53  ;;  %v5152_v56 = vsel %vm4176_vm13, %v4163_v30, %v4215_v16  ;;  %v4322_v21 = vmul.f32 %v5111_v17, %v4219_v0  ;;  %v5158_v16 = vld [vmem:[#allocation70_spill] sm:$0xff]  ;;  %v5163_v38 = vld [vmem:[#allocation51_spill] sm:$0xff] }
 0x19c   : > { %v1570_v45 = vadd.f32 %v1568_v44, %v1377_v58  ;;  %v4318_v2 = vadd.f32 %v5152_v56, %v4139_v60  ;;  %v1956_v35 = vmul.f32 -0.5, %v5133_v28  ;;  %v2089_v25 = vadd.f32 %v1817_v6, %v5153_v43  ;;  %v2915_v20 = vpop.eup %2914  ;;  %v5162_v50 = vld [vmem:[#allocation58_spill] sm:$0xff] }
 0x19d   : > { %v5154_v19 = vmax.f32 %v5124_v12, 0.0  ;;  %v1591_v62 = vmax.f32 %v5136_v54, 0.0  ;;  %v1962_v10 = vadd.f32 1.0, %v5151_v13  ;;  %v1832_v60 = vmul.f32 %v5128_v1, %v1831_v41  ;;  %v5159_v12 = vld [vmem:[#allocation89_spill] sm:$0xff]  ;;  %v5161_v41 = vld [vmem:[#allocation40_spill] sm:$0xff] }
 0x19e   : > { %1571 = vst [vmem:[#allocation3] sm:$0x3] %v1570_v45  ;;  %v5155_v30 = vand.u32 2147483647, %v5121_v18  ;;  %v4341_v37 = vadd.f32 1.0, %v5158_v16  ;;  %2918 = vlog2.f32 %v1989_v48  ;;  %2156 = vperm.xlu0 %2688, %v2089_v25   ;;  %2171 = vperm.xlu1 %2689, %v4039_v55   ;;  %v1949_v9 = vmul.f32 %v5121_v18, %v1948_v49  ;;  %v5164_v55 = vld [vmem:[#allocation88_spill] sm:$0xff] }
 0x19f   : > { %v4329_v36 = vsub.f32 %v5154_v19, %v4237_v59  ;;  %v2007_v59 = vadd.f32 1.0, %v5159_v12  ;;  %vm1834_vm10 = vcmp.lt.f32.partialorder %v1833_v52, 0.0004427343  ;;  %v1966_v1 = vadd.f32 1.0, %v1965_v4 }
 0x1a0   : > { %vm4336_vm8 = vcmp.lt.f32.partialorder %v5155_v30, 0.0004427343  ;;  %v1626_v58 = vmul.f32 %v5161_v41, %v5160_v26  ;;  %v1835_v7 = vsel %vm1834_vm10, %v1832_v60, %v1829_v14  ;;  %v1594_v24 = vmax.f32 %v5160_v26, 0.0  ;;  %v5165_v14 = vld [vmem:[#allocation94_spill] sm:$0xff] }
 0x1a1   : > { %v1957_v46 = vadd.f32 1.0, %v1956_v35  ;;  %v1625_v53 = vmul.f32 %v5163_v38, %v5162_v50  ;;  %v2091_v48 = vadd.f32 %v1835_v7, %v3977_v31  ;;  %2920 = vlog2.f32 %v1962_v10  ;;  %v2917_v49 = vpop.eup %2916  ;;  %v5166_v10 = vld [vmem:[#allocation71_spill] sm:$0xff]  ;;  %v5167_v30 = vld [vmem:[#allocation62_spill] sm:$0xff] }
 0x1a2   : > { %v1968_v52 = vand.u32 2147483647, %v5151_v13  ;;  %v1980_v44 = vadd.f32 1.0, %v5164_v55  ;;  %v1974_v18 = vmul.f32 -0.5, %v5134_v57  ;;  %v1593_v4 = vmax.f32 %v5162_v50, 0.0  ;;  %2177 = vperm.xlu1 %2689, %v4092_v61   ;;  %v5169_v38 = vld [vmem:[#allocation66_spill] sm:$0xff] }
 0x1a3   : > { %v1959_v6 = vand.u32 2147483647, %v5133_v28  ;;  %2922 = vlog2.f32 %v2007_v59  ;;  %v2025_v45 = vadd.f32 1.0, %v5165_v14  ;;  %2162 = vperm.xlu0 %2688, %v2091_v48   ;;  %v1946_v56 = vmul.f32 0.6931472, %v2911_v51 }
 0x1a4   : > { %v4360_v31 = vmul.f32 %v5151_v13, %v1966_v1  ;;  %v4362_v35 = vsub.f32 %v1594_v24, %v1626_v58  ;;  %v1955_v43 = vmul.f32 0.6931472, %v2915_v20  ;;  %v1958_v25 = vmul.f32 %v5133_v28, %v1957_v46  ;;  %v5168_v13 = vld [vmem:[#allocation92_spill] sm:$0xff] }
 0x1a5   : > { %v1657_v19 = vsub.f32 %v1593_v4, %v1625_v53  ;;  %v1596_v60 = vmax.f32 %v5166_v10, 0.0  ;;  %v1627_v59 = vmul.f32 %v3962_v39, %v5167_v30  ;;  %2924 = vlog2.f32 %v1980_v44 }
 0x1a6   : > { %v1975_v26 = vadd.f32 1.0, %v1974_v18  ;;  %v1977_v41 = vand.u32 2147483647, %v5134_v57  ;;  %v1992_v61 = vmul.f32 -0.5, %v5150_v3  ;;  %vm1960_vm13 = vcmp.lt.f32.partialorder %v1959_v6, 0.0004427343  ;;  %2183 = vperm.xlu1 %2689, %v4137_v11  }
 0x1a7   : > { %v1595_v51 = vmax.f32 %v5167_v30, 0.0  ;;  %v1998_v1 = vadd.f32 1.0, %v5168_v13  ;;  %2926 = vlog2.f32 %v2025_v45  ;;  %2168 = vperm.xlu0 %2688, %v4057_v8   ;;  %v1952_v28 = vsel %vm4336_vm8, %v1949_v9, %v1946_v56  ;;  %v5175_v6 = vld [vmem:[#allocation47_spill] sm:$0xff] }
 0x1a8   : > { %v1961_v39 = vsel %vm1960_vm13, %v1958_v25, %v1955_v43  ;;  %v1983_v58 = vmul.f32 -0.5, %v5164_v55  ;;  %v1973_v7 = vmul.f32 0.6931472, %v2917_v49  ;;  %v2919_v20 = vpop.eup %2918  ;;  %v1986_v46 = vand.u32 2147483647, %v5164_v55  ;;  %v5174_v49 = vld [vmem:[#allocation95_spill] sm:$0xff] }
 0x1a9   : > { %v2105_v24 = vadd.f32 %v1961_v39, %v1657_v19  ;;  %v1659_v50 = vsub.f32 %v1595_v51, %v1627_v59  ;;  %v1629_v53 = vmul.f32 %v4017_v42, %v5169_v38  ;;  %v1976_v48 = vmul.f32 %v5134_v57, %v1975_v26  ;;  %v5176_v59 = vld [vmem:[#allocation72_spill] sm:$0xff] }
 0x1aa   : > { %vm4381_vm12 = vcmp.lt.f32.partialorder %v1977_v41, 0.0004427343  ;;  %v1993_v11 = vadd.f32 1.0, %v1992_v61  ;;  %v2010_v0 = vmul.f32 -0.5, %v5159_v12  ;;  %vm4386_vm9 = vcmp.lt.f32.partialorder %v1968_v52, 0.0004427343 }
 0x1ab   : > { %2928 = vlog2.f32 %v1998_v1  ;;  %v1597_v44 = vmax.f32 %v5169_v38, 0.0  ;;  %v1995_v18 = vand.u32 2147483647, %v5150_v3  ;;  %v2016_v42 = vadd.f32 1.0, %v5174_v49  ;;  %2174 = vperm.xlu0 %2688, %v4111_v33   ;;  %2204 = vperm.xlu1 %2689, %v2105_v24   ;;  %v2921_v57 = vpop.eup %2920  ;;  %v5179_v1 = vld [vmem:[#allocation49_spill] sm:$0xff] }
 0x1ac   : > { %v2104_v4 = vadd.f32 %v1952_v28, %v4329_v36  ;;  %v1628_v45 = vmul.f32 %v5175_v6, %v5166_v10  ;;  %v1979_v52 = vsel %vm4381_vm12, %v1976_v48, %v1973_v7  ;;  %v1991_v56 = vmul.f32 0.6931472, %v2919_v20  ;;  %v5180_v38 = vld [vmem:[#allocation77_spill] sm:$0xff] }
 0x1ad   : > { %v2923_v43 = vpop.eup %2922  ;;  %v1984_v25 = vadd.f32 1.0, %v1983_v58  ;;  %v2107_v19 = vadd.f32 %v1979_v52, %v1659_v50  ;;  %v1661_v30 = vsub.f32 %v1597_v44, %v1629_v53  ;;  %v1631_v26 = vmul.f32 %v4068_v29, %v5176_v59  ;;  %v5184_v52 = vld [vmem:[#allocation75_spill] sm:$0xff] }
 0x1ae   : > { %v1994_v33 = vmul.f32 %v5150_v3, %v1993_v11  ;;  %v2011_v41 = vadd.f32 1.0, %v2010_v0  ;;  %v2013_v61 = vand.u32 2147483647, %v5159_v12  ;;  %v2028_v36 = vmul.f32 -0.5, %v5165_v14 }
 0x1af   : > { %vm4404_vm8 = vcmp.lt.f32.partialorder %v1986_v46, 0.0004427343  ;;  %vm1996_vm10 = vcmp.lt.f32.partialorder %v1995_v18, 0.0004427343  ;;  %2930 = vlog2.f32 %v2016_v42  ;;  %v1599_v51 = vmax.f32 %v5176_v59, 0.0  ;;  %2180 = vperm.xlu0 %2688, %v4167_v5   ;;  %2210 = vperm.xlu1 %2689, %v2107_v19   ;;  %v2925_v29 = vpop.eup %2924 }
 0x1b0   : > { %v2034_v28 = vadd.f32 1.0, %v5179_v1  ;;  %v1964_v3 = vmul.f32 0.6931472, %v2921_v57  ;;  %v1660_v39 = vsub.f32 %v1596_v60, %v1628_v45  ;;  %v1997_v58 = vsel %vm1996_vm10, %v1994_v33, %v1991_v56  ;;  %v4428_v57 = vpop.permute.xlu1 %1123  ;;  %v5185_v56 = vld [vmem:[#allocation35_spill] sm:$0xff] }
 0x1b1   : > { %v2009_v7 = vmul.f32 0.6931472, %v2923_v43  ;;  %v2927_v20 = vpop.eup %2926  ;;  %v1985_v24 = vmul.f32 %v5164_v55, %v1984_v25  ;;  %v2109_v46 = vadd.f32 %v1997_v58, %v1661_v30  ;;  %v1663_v50 = vsub.f32 %v1599_v51, %v1631_v26  ;;  %v5183_v55 = vld [vmem:[#allocation97_spill] sm:$0xff]  ;;  %v5186_v26 = vld [vmem:[#allocation99_spill] sm:$0xff] }
 0x1b2   : > { %v1633_v53 = vmul.f32 %v4122_v32, %v5180_v38  ;;  %v2001_v48 = vmul.f32 -0.5, %v5168_v13  ;;  %v2012_v8 = vmul.f32 %v5159_v12, %v2011_v41  ;;  %vm4416_vm13 = vcmp.lt.f32.partialorder %v2013_v61, 0.0004427343 }
 0x1b3   : > { %v2029_v11 = vadd.f32 1.0, %v2028_v36  ;;  %2932 = vlog2.f32 %v2034_v28  ;;  %v1601_v60 = vmax.f32 %v5180_v38, 0.0  ;;  %v2031_v0 = vand.u32 2147483647, %v5165_v14  ;;  %2201 = vperm.xlu0 %2688, %v2104_v4   ;;  %2216 = vperm.xlu1 %2689, %v2109_v46  }
 0x1b4   : > { %v2043_v44 = vadd.f32 1.0, %v5183_v55  ;;  %v1970_v32 = vsel %vm4386_vm9, %v4360_v31, %v1964_v3  ;;  %v1982_v18 = vmul.f32 0.6931472, %v2925_v29  ;;  %v2015_v12 = vsel %vm4416_vm13, %v2012_v8, %v2009_v7  ;;  %v5187_v29 = vld [vmem:[#allocation79_spill] sm:$0xff]  ;;  %v4449_v10 = vpop.permute.xlu1 %1126 }
 0x1b5   : > { %v2027_v42 = vmul.f32 0.6931472, %v2927_v20  ;;  %v2929_v6 = vpop.eup %2928  ;;  %v2106_v45 = vadd.f32 %v1970_v32, %v4362_v35  ;;  %v1630_v43 = vmul.f32 %v5185_v56, %v5184_v52  ;;  %v2111_v25 = vadd.f32 %v2015_v12, %v1663_v50  ;;  %v5199_v56 = vld [vmem:[#allocation57_spill] sm:$0xff] }
 0x1b6   : > { %v1665_v4 = vsub.f32 %v1601_v60, %v1633_v53  ;;  %v2002_v19 = vadd.f32 1.0, %v2001_v48  ;;  %v2004_v30 = vand.u32 2147483647, %v5168_v13  ;;  %v2019_v31 = vmul.f32 -0.5, %v5174_v49  ;;  %v5197_v48 = vld [vmem:[#allocation53_spill] sm:$0xff] }
 0x1b7   : > { %v2030_v9 = vmul.f32 %v5165_v14, %v2029_v11  ;;  %v1598_v59 = vmax.f32 %v5184_v52, 0.0  ;;  %vm2032_vm12 = vcmp.lt.f32.partialorder %v2031_v0, 0.0004427343  ;;  %v2052_v33 = vadd.f32 1.0, %v5186_v26  ;;  %2207 = vperm.xlu0 %2688, %v2106_v45   ;;  %2222 = vperm.xlu1 %2689, %v2111_v25   ;;  %v5188_v14 = vld [vmem:[#allocation50_spill] sm:$0xff]  ;;  %v5206_v20 = vld [vmem:[#allocation69_spill] sm:$0xff] }
 0x1b8   : > { %2934 = vlog2.f32 %v2043_v44  ;;  %v1988_v35 = vsel %vm4404_vm8, %v1985_v24, %v1982_v18  ;;  %v2000_v41 = vmul.f32 0.6931472, %v2929_v6  ;;  %v1632_v3 = vmul.f32 %v5188_v14, %v5187_v29  ;;  %v5198_v18 = vld [vmem:[#allocation85_spill] sm:$0xff] }
 0x1b9   : > { %2936 = vlog2.f32 %v4341_v37  ;;  %v2033_v61 = vsel %vm2032_vm12, %v2030_v9, %v2027_v42  ;;  %v2931_v36 = vpop.eup %2930  ;;  %v2108_v51 = vadd.f32 %v1988_v35, %v1660_v39  ;;  %v1662_v28 = vsub.f32 %v1598_v59, %v1630_v43 }
 0x1ba   : > { %v2113_v58 = vadd.f32 %v2033_v61, %v1665_v4  ;;  %v2003_v7 = vmul.f32 %v5168_v13, %v2002_v19  ;;  %vm4444_vm9 = vcmp.lt.f32.partialorder %v2004_v30, 0.0004427343  ;;  %v2020_v46 = vadd.f32 1.0, %v2019_v31  ;;  %v4484_v30 = vpop.permute.xlu0 %1120  ;;  %v4486_v31 = vpop.permute.xlu1 %1132  ;;  %v5202_v61 = vld [vmem:[#allocation64_spill] sm:$0xff] }
 0x1bb   : > { %v2037_v37 = vmul.f32 -0.5, %v5179_v1  ;;  %v5191_v24 = vand.u32 2147483647, %v5098_v23  ;;  %v5194_v50 = vand.u32 2147483647, %v5111_v17  ;;  %v1600_v13 = vmax.f32 %v5187_v29, 0.0  ;;  %2213 = vperm.xlu0 %2688, %v2108_v51  }
 0x1bc   : > { %v2022_v53 = vand.u32 2147483647, %v5174_v49  ;;  %2938 = vlog2.f32 %v2052_v33  ;;  %v2061_v8 = vadd.f32 1.0, %v5197_v48  ;;  %2228 = vperm.xlu1 %2689, %v2113_v58   ;;  %v4467_v23 = vmul.f32 0.6931472, %v4233_v34  ;;  %v5205_v58 = vld [vmem:[#allocation59_spill] sm:$0xff] }
 0x1bd   : > { %vm4453_vm8 = vcmp.lt.f32.partialorder %v5191_v24, 0.0004427343  ;;  %vm4459_vm10 = vcmp.lt.f32.partialorder %v5194_v50, 0.0004427343  ;;  %v1938_v5 = vmul.f32 -0.5, %v5158_v16  ;;  %v2006_v17 = vsel %vm4444_vm9, %v2003_v7, %v2000_v41  ;;  %v2933_v60 = vpop.eup %2932  ;;  %v5201_v41 = vld [vmem:[#allocation82_spill] sm:$0xff] }
 0x1be   : > { %v2018_v11 = vmul.f32 0.6931472, %v2931_v36  ;;  %v1941_v0 = vand.u32 2147483647, %v5158_v16  ;;  %v2110_v44 = vadd.f32 %v2006_v17, %v1662_v28  ;;  %v1664_v32 = vsub.f32 %v1600_v13, %v1632_v3  ;;  %v4509_v13 = vpop.permute.xlu0 %1129 }
 0x1bf   : > { %v1634_v12 = vmul.f32 %v4090_v47, %v5198_v18  ;;  %v2021_v42 = vmul.f32 %v5174_v49, %v2020_v46  ;;  %v2038_v6 = vadd.f32 1.0, %v2037_v37  ;;  %v2040_v34 = vand.u32 2147483647, %v5179_v1  ;;  %v5200_v47 = vld [vmem:[#allocation55_spill] sm:$0xff]  ;;  %v5207_v46 = vld [vmem:[#allocation56_spill] sm:$0xff] }
 0x1c0   : > { %v2046_v45 = vmul.f32 -0.5, %v5183_v55  ;;  %vm2023_vm13 = vcmp.lt.f32.partialorder %v2022_v53, 0.0004427343  ;;  %v1602_v52 = vmax.f32 %v5198_v18, 0.0  ;;  %v2070_v43 = vadd.f32 1.0, %v5199_v56  ;;  %2219 = vperm.xlu0 %2688, %v2110_v44   ;;  %2186 = vperm.xlu1 %2689, %v4318_v2   ;;  %v4520_v18 = vpop.permute.xlu1 %1138 }
 0x1c1   : > { %2940 = vlog2.f32 %v2061_v8  ;;  %v1919_v25 = vmul.f32 0.6931472, %v4284_v15  ;;  %v1623_v4 = vmul.f32 %v5200_v47, %v5136_v54  ;;  %v2024_v49 = vsel %vm2023_vm13, %v2021_v42, %v2018_v11  ;;  %v5208_v8 = vld [vmem:[#allocation73_spill] sm:$0xff]  ;;  %v5209_v11 = vld [vmem:[#allocation42_spill] sm:$0xff] }
 0x1c2   : > { %v2036_v19 = vmul.f32 0.6931472, %v2933_v60  ;;  %v2935_v9 = vpop.eup %2934  ;;  %v1939_v59 = vadd.f32 1.0, %v1938_v5  ;;  %v2112_v33 = vadd.f32 %v2024_v49, %v1664_v32  ;;  %v1666_v35 = vsub.f32 %v1602_v52, %v1634_v12  ;;  %v5210_v60 = vld [vmem:[#allocation63_spill] sm:$0xff]  ;;  %v5214_v49 = vld [vmem:[#allocation37_spill] sm:$0xff] }
 0x1c3   : > { %v1635_v36 = vmul.f32 %v5202_v61, %v5201_v41  ;;  %v2937_v51 = vpop.eup %2936  ;;  %v2039_v2 = vmul.f32 %v5179_v1, %v2038_v6  ;;  %vm4491_vm12 = vcmp.lt.f32.partialorder %v2040_v34, 0.0004427343  ;;  %v2055_v28 = vmul.f32 -0.5, %v5186_v26  ;;  %v5213_v6 = vld [vmem:[#allocation39_spill] sm:$0xff] }
 0x1c4   : > { %v2047_v29 = vadd.f32 1.0, %v2046_v45  ;;  %v1603_v14 = vmax.f32 %v5201_v41, 0.0  ;;  %v2049_v3 = vand.u32 2147483647, %v5183_v55  ;;  %2942 = vlog2.f32 %v2070_v43  ;;  %2225 = vperm.xlu0 %2688, %v2112_v33   ;;  %2189 = vperm.xlu1 %2689, %v5206_v20  }
 0x1c5   : > { %v2079_v7 = vadd.f32 1.0, %v5205_v58  ;;  %v1934_v1 = vsel %vm4453_vm8, %v5207_v46, %v4467_v23  ;;  %v1925_v37 = vsel %vm4459_vm10, %v4322_v21, %v1919_v25  ;;  %v2042_v24 = vsel %vm4491_vm12, %v2039_v2, %v2036_v19  ;;  %v5215_v19 = vld [vmem:[#allocation68_spill] sm:$0xff] }
 0x1c6   : > { %v2045_v50 = vmul.f32 0.6931472, %v2935_v9  ;;  %v2939_v53 = vpop.eup %2938  ;;  %v2101_v5 = vadd.f32 %v1925_v37, %v5208_v8  ;;  %v2114_v17 = vadd.f32 %v2042_v24, %v1666_v35  ;;  %v1636_v44 = vmul.f32 %v5210_v60, %v5209_v11 }
 0x1c7   : > { %v1667_v32 = vsub.f32 %v1603_v14, %v1635_v36  ;;  %vm4514_vm9 = vcmp.lt.f32.partialorder %v1941_v0, 0.0004427343  ;;  %v2056_v38 = vadd.f32 1.0, %v2055_v28  ;;  %v2048_v21 = vmul.f32 %v5183_v55, %v2047_v29  ;;  %v4532_v36 = vpop.permute.xlu0 %1135  ;;  %v5216_v28 = vld [vmem:[#allocation48_spill] sm:$0xff] }
 0x1c8   : > { %v2064_v23 = vmul.f32 -0.5, %v5197_v48  ;;  %v1604_v12 = vmax.f32 %v5209_v11, 0.0  ;;  %v2058_v42 = vand.u32 2147483647, %v5186_v26  ;;  %vm2050_vm8 = vcmp.lt.f32.partialorder %v2049_v3, 0.0004427343  ;;  %2231 = vperm.xlu0 %2688, %v2114_v17   ;;  %2192 = vperm.xlu1 %2689, %v2101_v5  }
 0x1c9   : > { %2944 = vlog2.f32 %v2079_v7  ;;  %v2102_v0 = vadd.f32 %v1934_v1, %v5213_v6  ;;  %v1937_v34 = vmul.f32 0.6931472, %v2937_v51  ;;  %v2054_v45 = vmul.f32 0.6931472, %v2939_v53  ;;  %v5217_v29 = vld [vmem:[#allocation36_spill] sm:$0xff]  ;;  %v5218_v11 = vld [vmem:[#allocation38_spill] sm:$0xff] }
 0x1ca   : > { %v2051_v52 = vsel %vm2050_vm8, %v2048_v21, %v2045_v50  ;;  %v1655_v55 = vsub.f32 %v1591_v62, %v1623_v4  ;;  %v1668_v25 = vsub.f32 %v1604_v12, %v1636_v44  ;;  %v1637_v9 = vmul.f32 %v5215_v19, %v5214_v49 }
 0x1cb   : > { %v2941_v43 = vpop.eup %2940  ;;  %v2115_v47 = vadd.f32 %v2051_v52, %v1667_v32  ;;  %v1940_v33 = vmul.f32 %v5158_v16, %v1939_v59  ;;  %v2057_v35 = vmul.f32 %v5186_v26, %v2056_v38  ;;  %v2073_v41 = vmul.f32 -0.5, %v5199_v56  ;;  %v4538_v16 = vpop.permute.xlu1 %1144 }
 0x1cc   : > { %v2065_v61 = vadd.f32 1.0, %v2064_v23  ;;  %vm2059_vm10 = vcmp.lt.f32.partialorder %v2058_v42, 0.0004427343  ;;  %v1605_v51 = vmax.f32 %v5214_v49, 0.0  ;;  %v2067_v54 = vand.u32 2147483647, %v5197_v48  ;;  %2195 = vperm.xlu1 %2689, %v2102_v0   ;;  %v4546_v53 = vpop.permute.xlu0 %1141 }
 0x1cd   : > { %2234 = vperm.xlu0 %2688, %v2115_v47   ;;  %v1943_v62 = vsel %vm4514_vm9, %v1940_v33, %v1937_v34  ;;  %v2060_v4 = vsel %vm2059_vm10, %v2057_v35, %v2054_v45  ;;  %v2063_v2 = vmul.f32 0.6931472, %v2941_v43  ;;  %v1638_v14 = vmul.f32 %v5217_v29, %v5216_v28  ;;  %v5219_v35 = vld [vmem:[#allocation22_spill] sm:$0xff] }
 0x1ce   : > { %v2943_v26 = vpop.eup %2942  ;;  %v2103_v59 = vadd.f32 %v1943_v62, %v1655_v55  ;;  %v2116_v15 = vadd.f32 %v2060_v4, %v1668_v25  ;;  %v1669_v3 = vsub.f32 %v1605_v51, %v1637_v9  ;;  %v2074_v7 = vadd.f32 1.0, %v2073_v41 }
 0x1cf   : > { %v2066_v20 = vmul.f32 %v5197_v48, %v2065_v61  ;;  %v2082_v46 = vmul.f32 -0.5, %v5205_v58  ;;  %v1606_v1 = vmax.f32 %v5216_v28, 0.0  ;;  %v2076_v37 = vand.u32 2147483647, %v5199_v56  ;;  %v4551_v32 = vpop.permute.xlu1 %1150 }
 0x1d0   : > { %vm2068_vm13 = vcmp.lt.f32.partialorder %v2067_v54, 0.0004427343  ;;  %2198 = vperm.xlu1 %2689, %v2103_v59   ;;  %v2072_v24 = vmul.f32 0.6931472, %v2943_v26  ;;  %v1639_v60 = vmul.f32 %v4262_v40, %v5218_v11  ;;  %v2075_v48 = vmul.f32 %v5199_v56, %v2074_v7  ;;  %v4556_v0 = vpop.permute.xlu0 %1147  ;;  %v5220_v54 = vld [vmem:[#allocation20_spill] sm:$0xff] }
 0x1d1   : > { %2237 = vperm.xlu0 %2688, %v2116_v15   ;;  %v2069_v50 = vsel %vm2068_vm13, %v2066_v20, %v2063_v2  ;;  %v1670_v5 = vsub.f32 %v1606_v1, %v1638_v14  ;;  %v2083_v44 = vadd.f32 1.0, %v2082_v46  ;;  %vm2077_vm12 = vcmp.lt.f32.partialorder %v2076_v37, 0.0004427343  ;;  %v5221_v2 = vld [vmem:[#allocation19_spill] sm:$0xff]  ;;  %v5222_v15 = vld [vmem:[#allocation21_spill] sm:$0xff] }
 0x1d2   : > { %v2117_v17 = vadd.f32 %v2069_v50, %v1669_v3  ;;  %v1607_v39 = vmax.f32 %v5218_v11, 0.0  ;;  %v2085_v38 = vand.u32 2147483647, %v5205_v58  ;;  %v2078_v21 = vsel %vm2077_vm12, %v2075_v48, %v2072_v24 }
 0x1d3   : > { %v2945_v8 = vpop.eup %2944  ;;  %v2118_v12 = vadd.f32 %v2078_v21, %v1670_v5  ;;  %v2084_v6 = vmul.f32 %v5205_v58, %v2083_v44  ;;  %v4558_v56 = vpop.permute.xlu1 %1156  ;;  %v1222_v51 = vrot.slane %v4428_v57, %v5219_v35  ;;  %v1218_v62 = vrot.slane %v4484_v30, %v5220_v54  ;;  %v5223_v30 = vld [vmem:[#allocation24_spill] sm:$0xff]  ;;  %v5225_v5 = vld [vmem:[#allocation26_spill] sm:$0xff] }
 0x1d4   : > { %v2081_v23 = vmul.f32 0.6931472, %v2945_v8  ;;  %v1671_v42 = vsub.f32 %v1607_v39, %v1639_v60  ;;  %vm2086_vm9 = vcmp.lt.f32.partialorder %v2085_v38, 0.0004427343  ;;  %v4560_v45 = vpop.permute.xlu0 %1153  ;;  %v1227_v26 = vrot.slane %v4449_v10, %v5221_v2  ;;  %v5226_v39 = vld [vmem:[#allocation25_spill] sm:$0xff] }
 0x1d5   : > { %2240 = vperm.xlu0 %2688, %v2117_v17   ;;  %v1232_v28 = vrot.slane %v4509_v13, %v5222_v15  ;;  %v1223_v57 = vsel %vm503_vm0, %v1222_v51, %v1218_v62  ;;  %v1237_v20 = vrot.slane %v4486_v31, %v5223_v30  ;;  %v5224_v13 = vld [vmem:[#allocation23_spill] sm:$0xff]  ;;  %v1247_v17 = vrot.slane %v4520_v18, %v5225_v5  ;;  %v5230_v51 = vld [vmem:[#allocation29_spill] sm:$0xff] }
 0x1d6   : > { %v2087_v40 = vsel %vm2086_vm9, %v2084_v6, %v2081_v23  ;;  %v1228_v7 = vsel %vm510_vm1, %v1227_v26, %v1223_v57  ;;  %v1242_v24 = vrot.slane %v4532_v36, %v5224_v13  ;;  %v1252_v38 = vrot.slane %v4546_v53, %v5226_v39 }
 0x1d7   : > { %v2119_v34 = vadd.f32 %v2087_v40, %v1671_v42  ;;  %v4562_v52 = vpop.permute.xlu1 %1162  ;;  %v1233_v37 = vsel %vm517_vm2, %v1232_v28, %v1228_v7  ;;  %vm5229_vm8 = vcmask 654912   ;;  %v1277_v26 = vrot.slane %v4558_v56, %v5101_v27 }
 0x1d8   : > { %v4564_v43 = vpop.permute.xlu0 %1159  ;;  %v1238_v11 = vsel %vm524_vm3, %v1237_v20, %v1233_v37  ;;  %vm5231_vm10 = vmmov %vm5229_vm8  ;;  %vm5232_vm13 = vcmask 720512   ;;  %vm5234_vm9 = vcmask 786112  }
 0x1d9   : > { %2243 = vperm.xlu0 %2688, %v2118_v12   ;;  %v1243_v44 = vsel %vm531_vm4, %v1242_v24, %v1238_v11  ;;  %v5227_v12 = vld [vmem:[#allocation28_spill] sm:$0xff]  ;;  %vm5233_vm12 = vmmov %vm5232_vm13 }
 0x1da   : > { %v1257_v18 = vrot.slane %v4538_v16, %v5227_v12  ;;  %v1248_v42 = vsel %vm538_vm5, %v1247_v17, %v1243_v44 }
 0x1db   : > { %v1169_v55 = vpop.permute.xlu1 %1168 }
 0x1dc   : > { %v4566_v25 = vpop.permute.xlu0 %1165  ;;  %v1297_v4 = vrot.slane %v1169_v55, %v5220_v54  ;;  %v5228_v55 = vld [vmem:[#allocation27_spill] sm:$0xff] }
 0x1dd   : > { %2246 = vperm.xlu0 %2688, %v2119_v34   ;;  %v1253_v34 = vsel %vm545_vm6, %v1252_v38, %v1248_v42 }
 0x1de   : > { %v1258_v16 = vsel %vm552_vm7, %v1257_v18, %v1253_v34 }
 0x1df   : > { %v1175_v47 = vpop.permute.xlu1 %1174 }
 0x1e0   : > { %v1172_v58 = vpop.permute.xlu0 %1171  ;;  %v1306_v59 = vrot.slane %v1175_v47, %v5221_v2  ;;  %v1262_v47 = vrot.slane %v4556_v0, %v5228_v55  ;;  %v1272_v0 = vrot.slane %v4560_v45, %v5230_v51 }
 0x1e1   : > { %v1301_v41 = vrot.slane %v1172_v58, %v5219_v35 }
 0x1e3   : > { %v1181_v49 = vpop.permute.xlu1 %1180  ;;  %v1302_v29 = vsel %vm503_vm0, %v1301_v41, %v1297_v4 }
 0x1e4   : > { %v1178_v19 = vpop.permute.xlu0 %1177  ;;  %v1316_v46 = vrot.slane %v1181_v49, %v5223_v30  ;;  %v1307_v10 = vsel %vm510_vm1, %v1306_v59, %v1302_v29 }
 0x1e5   : > { %v1311_v14 = vrot.slane %v1178_v19, %v5222_v15  ;;  %v1267_v19 = vrot.slane %v4551_v32, %v5012_v63 }
 0x1e7   : > { %v1187_v9 = vpop.permute.xlu1 %1186  ;;  %v1312_v50 = vsel %vm517_vm2, %v1311_v14, %v1307_v10 }
 0x1e8   : > { %v1326_v31 = vrot.slane %v1187_v9, %v5225_v5  ;;  %v1317_v60 = vsel %vm524_vm3, %v1316_v46, %v1312_v50  ;;  %v5237_v46 = vld [vmem:[#allocation34_spill] sm:$0xff] }
 0x1e9   : > { %v1287_v56 = vrot.slane %v4562_v52, %v5237_v46  ;;  %v880_v52 = vld [vmem:[#allocation2] sm:$0x3] }
 0x1ee   : > { %v1184_v33 = vpop.permute.xlu0 %1183 }
 0x1ef   : > { %v1321_v8 = vrot.slane %v1184_v33, %v5224_v13 }
 0x1f1   : > { %v1322_v36 = vsel %vm531_vm4, %v1321_v8, %v1317_v60 }
 0x1f2   : > { %v1193_v61 = vpop.permute.xlu1 %1192  ;;  %v1327_v40 = vsel %vm538_vm5, %v1326_v31, %v1322_v36 }
 0x1f3   : > { %v1336_v6 = vrot.slane %v1193_v61, %v5227_v12  ;;  %v1263_v61 = vsel %vm5229_vm8, %v1262_v47, %v1258_v16  ;;  %vm5236_vm8 = vmmov %vm5234_vm9 }
 0x1f4   : > { %v1268_v32 = vsel %vm5232_vm13, %v1267_v19, %v1263_v61 }
 0x1f5   : > { %v1273_v14 = vsel %vm5234_vm9, %v1272_v0, %v1268_v32 }
 0x1f6   : > { %v1278_v10 = vsel %vm580_vm11, %v1277_v26, %v1273_v14 }
 0x1f7   : > { %v1190_v3 = vpop.permute.xlu0 %1189 }
 0x1f8   : > { %v1331_v21 = vrot.slane %v1190_v3, %v5226_v39  ;;  %v5235_v3 = vld [vmem:[#allocation31_spill] sm:$0xff] }
 0x1f9   : > { %v1282_v57 = vrot.slane %v4564_v43, %v5235_v3  ;;  %v1292_v43 = vrot.slane %v4566_v25, %v5137_v22 }
 0x1fa   : > { %v1332_v53 = vsel %vm545_vm6, %v1331_v21, %v1327_v40 }
 0x1fb   : > { %v1337_v33 = vsel %vm552_vm7, %v1336_v6, %v1332_v53 }
 0x1fc   : > { %v1199_v1 = vpop.permute.xlu1 %1198 }
 0x1fd   : > { %v1346_v9 = vrot.slane %v1199_v1, %v5012_v63 }
 0x201   : > { %v1196_v48 = vpop.permute.xlu0 %1195 }
 0x202   : > { %v1341_v58 = vrot.slane %v1196_v48, %v5228_v55 }
 0x204   : > { %v1205_v23 = vpop.permute.xlu1 %1204  ;;  %v1342_v62 = vsel %vm5231_vm10, %v1341_v58, %v1337_v33  ;;  %vm5238_vm10 = vcmask 917312  }
 0x205   : > { %v1356_v59 = vrot.slane %v1205_v23, %v5101_v27  ;;  %v1347_v28 = vsel %vm5233_vm12, %v1346_v9, %v1342_v62  ;;  %v1283_v50 = vsel %vm5238_vm10, %v1282_v57, %v1278_v10  ;;  %vm5239_vm13 = vmmov %vm5238_vm10  ;;  %vm5240_vm12 = vcmask 982912  }
 0x206   : > { %v1288_v31 = vsel %vm5240_vm12, %v1287_v56, %v1283_v50  ;;  %vm5241_vm9 = vmmov %vm5240_vm12 }
 0x207   : > { %v1293_v44 = vsel %vm601_vm15, %v1292_v43, %v1288_v31 }
 0x209   : > { %v1202_v49 = vpop.permute.xlu0 %1201 }
 0x20a   : > { %v1351_v4 = vrot.slane %v1202_v49, %v5230_v51 }
 0x20c   : > { %v1352_v45 = vsel %vm5236_vm8, %v1351_v4, %v1347_v28 }
 0x20d   : > { %v1211_v41 = vpop.permute.xlu1 %1210  ;;  %v1357_v37 = vsel %vm580_vm11, %v1356_v59, %v1352_v45 }
 0x20e   : > { %v1366_v1 = vrot.slane %v1211_v41, %v5237_v46 }
 0x211   : > { %v2154_v29 = vpop.permute.xlu1 %2153 }
 0x212   : > { %v1208_v7 = vpop.permute.xlu0 %1207  ;;  %v2251_v26 = vrot.slane %v2154_v29, %v5220_v54 }
 0x213   : > { %v1361_v20 = vrot.slane %v1208_v7, %v5235_v3 }
 0x215   : > { %v2160_v24 = vpop.permute.xlu1 %2159  ;;  %v1362_v8 = vsel %vm5239_vm13, %v1361_v20, %v1357_v37 }
 0x216   : > { %v1214_v17 = vpop.permute.xlu0 %1213  ;;  %v1367_v60 = vsel %vm5241_vm9, %v1366_v1, %v1362_v8  ;;  %v2260_v28 = vrot.slane %v2160_v24, %v5221_v2 }
 0x217   : > { %v1371_v11 = vrot.slane %v1214_v17, %v5137_v22 }
 0x219   : > { %v2166_v48 = vpop.permute.xlu1 %2165  ;;  %v1372_v38 = vsel %vm601_vm15, %v1371_v11, %v1367_v60 }
 0x21a   : > { %v1373_v36 = vsel %vm682_vm14, %v1372_v38, %v1293_v44  ;;  %v2270_v29 = vrot.slane %v2166_v48, %v5223_v30 }
 0x21b   : > { %v1375_v21 = vadd.f32 %v1373_v36, %v880_v52 }
 0x21d   : > { %v2157_v23 = vpop.permute.xlu0 %2156  ;;  %v2172_v25 = vpop.permute.xlu1 %2171  ;;  %1376 = vst [vmem:[#allocation2] sm:$0x3] %v1375_v21 }
 0x21e   : > { %v2255_v62 = vrot.slane %v2157_v23, %v5219_v35 }
 0x220   : > { %v2256_v45 = vsel %vm503_vm0, %v2255_v62, %v2251_v26 }
 0x221   : > { %v2178_v42 = vpop.permute.xlu1 %2177 }
 0x222   : > { %v2163_v18 = vpop.permute.xlu0 %2162 }
 0x223   : > { %v2265_v7 = vrot.slane %v2163_v18, %v5222_v15 }
 0x225   : > { %v4647_v40 = vpop.permute.xlu1 %2183 }
 0x226   : > { %v2169_v6 = vpop.permute.xlu0 %2168 }
 0x227   : > { %v2275_v37 = vrot.slane %v2169_v6, %v5224_v13 }
 0x22a   : > { %v2175_v34 = vpop.permute.xlu0 %2174  ;;  %v2205_v47 = vpop.permute.xlu1 %2204 }
 0x22b   : > { %v2334_v32 = vrot.slane %v2205_v47, %v5219_v35  ;;  %v2261_v35 = vsel %vm510_vm1, %v2260_v28, %v2256_v45  ;;  %v2285_v52 = vrot.slane %v2175_v34, %v5226_v39  ;;  %v2300_v34 = vrot.slane %v4647_v40, %v5012_v63  ;;  %v1575_v45 = vld [vmem:[#allocation5] sm:$0x3] }
 0x22e   : > { %v2181_v53 = vpop.permute.xlu0 %2180  ;;  %v2211_v58 = vpop.permute.xlu1 %2210 }
 0x22f   : > { %v2344_v10 = vrot.slane %v2211_v58, %v5222_v15  ;;  %v2280_v15 = vrot.slane %v2172_v25, %v5225_v5  ;;  %v2295_v25 = vrot.slane %v2181_v53, %v5228_v55 }
 0x232   : > { %v2202_v49 = vpop.permute.xlu0 %2201  ;;  %v2217_v19 = vpop.permute.xlu1 %2216 }
 0x233   : > { %v2330_v59 = vrot.slane %v2202_v49, %v5220_v54  ;;  %v2354_v43 = vrot.slane %v2217_v19, %v5224_v13  ;;  %v2290_v13 = vrot.slane %v2178_v42, %v5227_v12 }
 0x235   : > { %v2335_v56 = vsel %vm503_vm0, %v2334_v32, %v2330_v59  ;;  %vm5242_vm0 = vcmask 654912  }
 0x236   : > { %v2208_v16 = vpop.permute.xlu0 %2207  ;;  %v2223_v9 = vpop.permute.xlu1 %2222 }
 0x237   : > { %v2339_v14 = vrot.slane %v2208_v16, %v5221_v2  ;;  %v2266_v2 = vsel %vm517_vm2, %v2265_v7, %v2261_v35  ;;  %v2364_v48 = vrot.slane %v2223_v9, %v5226_v39  ;;  %v2423_v35 = vld [vmem:[#allocation4] sm:$0x3] (!%p2616_p3) }
 0x238   : > { %v2271_v17 = vsel %vm524_vm3, %v2270_v29, %v2266_v2  ;;  %v2419_v29 = vld [vmem:[#allocation3] sm:$0x3] (!%p2616_p3) }
 0x239   : > { %v2340_v54 = vsel %vm510_vm1, %v2339_v14, %v2335_v56  ;;  %vm5243_vm1 = vmmov %vm5242_vm0 }
 0x23a   : > { %v2214_v33 = vpop.permute.xlu0 %2213  ;;  %v2345_v8 = vsel %vm517_vm2, %v2344_v10, %v2340_v54  ;;  %vm5244_vm2 = vcmask 720512   ;;  %v2414_v54 = vld [vmem:[#allocation2] sm:$0x3] (!%p2616_p3) }
 0x23b   : > { %v2229_v41 = vpop.permute.xlu1 %2228  ;;  %v2349_v1 = vrot.slane %v2214_v33, %v5223_v30  ;;  %v2276_v30 = vsel %vm531_vm4, %v2275_v37, %v2271_v17 }
 0x23c   : > { %v2281_v38 = vsel %vm538_vm5, %v2280_v15, %v2276_v30  ;;  %v2374_v6 = vrot.slane %v2229_v41, %v5228_v55 }
 0x23d   : > { %v2350_v11 = vsel %vm524_vm3, %v2349_v1, %v2345_v8  ;;  %vm5245_vm3 = vmmov %vm5244_vm2 }
 0x23e   : > { %v2355_v44 = vsel %vm531_vm4, %v2354_v43, %v2350_v11  ;;  %vm5246_vm4 = vmmov %vm5236_vm8 }
 0x23f   : > { %v2220_v61 = vpop.permute.xlu0 %2219  ;;  %v4649_v0 = vpop.permute.xlu1 %2186  ;;  %vm5250_vm8 = vmmov %vm5241_vm9 }
 0x240   : > { %v2359_v31 = vrot.slane %v2220_v61, %v5225_v5  ;;  %v2286_v5 = vsel %vm545_vm6, %v2285_v52, %v2281_v38  ;;  %v2305_v49 = vrot.slane %v4649_v0, %v5230_v51 }
 0x241   : > { %v2291_v42 = vsel %vm552_vm7, %v2290_v13, %v2286_v5 }
 0x242   : > { %v2360_v36 = vsel %vm538_vm5, %v2359_v31, %v2355_v44  ;;  %vm5247_vm5 = vmmov %vm5246_vm4 }
 0x243   : > { %v2226_v4 = vpop.permute.xlu0 %2225  ;;  %v2190_v57 = vpop.permute.xlu1 %2189  ;;  %v2365_v39 = vsel %vm545_vm6, %v2364_v48, %v2360_v36  ;;  %vm5248_vm6 = vmmov %vm5238_vm10 }
 0x244   : > { %v2369_v21 = vrot.slane %v2226_v4, %v5227_v12  ;;  %v2296_v12 = vsel %vm5242_vm0, %v2295_v25, %v2291_v42  ;;  %v2310_v55 = vrot.slane %v2190_v57, %v5101_v27  ;;  %vm5251_vm10 = vmmov %vm5250_vm8 }
 0x246   : > { %v2370_v47 = vsel %vm552_vm7, %v2369_v21, %v2365_v39  ;;  %vm5249_vm7 = vmmov %vm5248_vm6 }
 0x247   : > { %v2232_v20 = vpop.permute.xlu0 %2231  ;;  %v2193_v50 = vpop.permute.xlu1 %2192  ;;  %v2375_v40 = vsel %vm5243_vm1, %v2374_v6, %v2370_v47 }
 0x248   : > { %v2379_v58 = vrot.slane %v2232_v20, %v5012_v63  ;;  %v2315_v33 = vrot.slane %v2193_v50, %v5235_v3  ;;  %v2301_v63 = vsel %vm5244_vm2, %v2300_v34, %v2296_v12 }
 0x249   : > { %v2306_v62 = vsel %vm5246_vm4, %v2305_v49, %v2301_v63 }
 0x24a   : > { %v2380_v61 = vsel %vm5245_vm3, %v2379_v58, %v2375_v40  ;;  %v2311_v26 = vsel %vm580_vm11, %v2310_v55, %v2306_v62 }
 0x24b   : > { %v2196_v23 = vpop.permute.xlu1 %2195 }
 0x24c   : > { %v2235_v24 = vpop.permute.xlu0 %2234  ;;  %v2320_v0 = vrot.slane %v2196_v23, %v5237_v46 }
 0x24d   : > { %v2384_v53 = vrot.slane %v2235_v24, %v5230_v51 }
 0x24f   : > { %v2199_v16 = vpop.permute.xlu1 %2198 }
 0x250   : > { %v2238_v60 = vpop.permute.xlu0 %2237  ;;  %v2325_v4 = vrot.slane %v2199_v16, %v5137_v22 }
 0x251   : > { %v2389_v19 = vrot.slane %v2238_v60, %v5101_v27  ;;  %v2385_v27 = vsel %vm5247_vm5, %v2384_v53, %v2380_v61 }
 0x253   : > { %v2390_v32 = vsel %vm580_vm11, %v2389_v19, %v2385_v27  ;;  %vm2415_vm11 = vcmask (!%p2616_p3), 1041408  }
 0x254   : > { %v2241_v18 = vpop.permute.xlu0 %2240  ;;  %v2416_v2 = vsel (!%p2616_p3), %vm2415_vm11, %v2414_v54, 0.0  ;;  %v2424_v37 = vsel (!%p2616_p3), %vm2415_vm11, %v2423_v35, 0.0 }
 0x255   : > { %v2394_v41 = vrot.slane %v2241_v18, %v5235_v3  ;;  %v2316_v3 = vsel %vm5248_vm6, %v2315_v33, %v2311_v26  ;;  %2417 = vadd.xlane.f32.xlu1 (!%p2616_p3), %v2416_v2 }
 0x256   : > { %v2321_v57 = vsel %vm5250_vm8, %v2320_v0, %v2316_v3 }
 0x257   : > { %v2395_v28 = vsel %vm5249_vm7, %v2394_v41, %v2390_v32  ;;  %v2326_v7 = vsel %vm601_vm15, %v2325_v4, %v2321_v57 }
 0x258   : > { %v2244_v9 = vpop.permute.xlu0 %2243 }
 0x259   : > { %v2399_v51 = vrot.slane %v2244_v9, %v5237_v46 }
 0x25b   : > { %v2400_v46 = vsel %vm5251_vm10, %v2399_v51, %v2395_v28 }
 0x25c   : > { %v2247_v59 = vpop.permute.xlu0 %2246 }
 0x25d   : > { %v2404_v14 = vrot.slane %v2247_v59, %v5137_v22  ;;  %2413 = sbr.rel (%p2616_p3) target bundleno = 789 (0x315), region = 48  ;;  %v2420_v22 = vsel (!%p2616_p3), %vm2415_vm11, %v2419_v29, 0.0 }
 0x25e   : > { %2421 = vadd.xlane.f32.xlu0 (!%p2616_p3), %v2420_v22 }
 0x25f   : > { %v2405_v20 = vsel %vm601_vm15, %v2404_v14, %v2400_v46  ;;  %vm2454_vm15 = vcmask (!%p2616_p3), 0  }
 0x260   : > { %v2406_v56 = vsel %vm682_vm14, %v2405_v20, %v2326_v7 }
 0x261   : > { %v2408_v10 = vadd.f32 %v2406_v56, %v1575_v45 }
 0x262   : > { %2425 = vadd.xlane.f32.xlu0 (!%p2616_p3), %v2424_v37 }
 0x263   : > { %2409 = vst [vmem:[#allocation5] sm:$0x3] %v2408_v10 }
 0x26a   : > { %v2440_v1 = vld [vmem:[#allocation5] sm:$0x3] }
 0x26b   : > { %v2441_v24 = vsel %vm2415_vm11, %v2440_v1, 0.0 }
 0x26c   : > { %2442 = vadd.xlane.f32.xlu1 %v2441_v24 }
 0x2e2   : > { %v2418_v43 = vpop.xlane.xlu1 %2417 }
 0x2e3   : > { %v2427_v52 = vmul.f32 2.0, %v2418_v43 }
 0x2eb   : > { %v2422_v50 = vpop.xlane.xlu0 %2421 }
 0x2ef   : > { %v2426_v8 = vpop.xlane.xlu0 %2425 }
 0x2f0   : > { %v2428_v15 = vadd.f32 %v2426_v8, %v2422_v50 }
 0x2f2   : > { %v2429_v17 = vadd.f32 1e-05, %v2428_v15 }
 0x2f4   : > { %2946 = vrcp.f32 %v2429_v17 }
 0x2f9   : > { %v2443_v11 = vpop.xlane.xlu1 %2442 }
 0x2fa   : > { %v2444_v31 = vsel %vm2415_vm11, %v2443_v11, 0.0 }
 0x2fb   : > { %v2445_v30 = vrot.slane %v2444_v31, 4 }
 0x2fd   : > { %v2446_v60 = vadd.f32 %v2445_v30, %v2444_v31 }
 0x2fe   : > { %v2947_v48 = vpop.eup %2946 }
 0x2ff   : > { %v2431_v44 = vmul.f32 %v2947_v48, %v2427_v52  ;;  %v2447_v13 = vrot.slane %v2446_v60, 2 }
 0x301   : > { %v2432_v38 = vsel %vm2415_vm11, %v2431_v44, 0.0  ;;  %v2448_v23 = vadd.f32 %v2447_v13, %v2446_v60 }
 0x302   : > { %v2433_v36 = vrot.slane %v2432_v38, 4 }
 0x303   : > { %v2449_v18 = vrot.slane %v2448_v23, 1 }
 0x304   : > { %v2434_v21 = vadd.f32 %v2433_v36, %v2432_v38 }
 0x305   : > { %v2450_v34 = vadd.f32 %v2449_v18, %v2448_v23 }
 0x306   : > { %v2435_v5 = vrot.slane %v2434_v21, 2 }
 0x307   : > { %v2451_v58 = vmul.f32 0.001953125, %v2450_v34 }
 0x308   : > { %v2436_v25 = vadd.f32 %v2435_v5, %v2434_v21 }
 0x30a   : > { %v2437_v6 = vrot.slane %v2436_v25, 1 }
 0x30c   : > { %v2438_v39 = vadd.f32 %v2437_v6, %v2436_v25 }
 0x30e   : > { %v2439_v42 = vmul.f32 0.5, %v2438_v39 }
 0x310   : > { %v2452_v47 = vsub.f32 1.0, %v2439_v42 }
 0x312   : > { %v2453_v12 = vadd.f32 %v2452_v47, %v2451_v58 }
 0x314   : > { %2455 = vst.msk [vmem:[#allocation11] sm:$0x1] %vm2454_vm15, %v2453_v12 }
 0x315 PF: > { %s2618_s11 = sshll.u32 %s3111_s3, 5  ;;  %s2470_s18 = sshll.u32 %s3194_s24, 4  ;;  %s2471_s18 = int_to_ptr.vmem [resolvable:$true] %s2470_s18 }
 0x316   : > { %s4727_s17 = scalar_lea.hbm %s4792_s4, %s2618_s11  ;;  %s2457_s29 = scalar_lea.sflag [#allocation9], %s3175_s14 }
 0x317   : > { %s2948_s8 = scalar_lea.vmem %s2471_s18, 32  ;;  %s3055_s13 = smov [#allocation10]  }
 0x318   : > { %p2949_p4 = scmp.ne.s32.totalorder %s2471_s18, %s2948_s8  ;;  %s2952_s16 = sshll.u32 %s3055_s13, 4  ;;  %s2953_s16 = int_to_ptr.vmem [resolvable:$false] %s2952_s16 }
 0x319   : > { %s2954_s19 = scalar_lea.vmem %s2953_s16, 64  ;;  %p2955_p8 = scmp.lt.s32.totalorder %s2471_s18, %s2953_s16 }
 0x31a   : > { %p2950_p5 = pnand %p2949_p4, %p3140_p9  ;;  %p2956_p12 = scmp.lt.s32.totalorder %s2954_s19, %s2948_s8 }
 0x31c   : > { %p2951_p6 = pneg %p2950_p5  ;;  %p2957_p13 = por %p2956_p12, %p2955_p8 }
 0x31e   : > { %p2958_p0 = pnand %p2957_p13, %p2951_p6 }
 0x320   : > { %2961 = shalt.err (!%p2958_p0)
}
 0x321   : > { %s2962_s14 = scalar_lea.hbm %s4727_s17, 32  ;;  %s2966_s26 = scalar_lea.hbm %s4792_s4, 64 }
 0x322   : > { %p2963_p1 = scmp.ne.s32.totalorder %s4727_s17, %s2962_s14  ;;  %p2967_p4 = scmp.lt.u32.totalorder %s4727_s17, %s4792_s4 }
 0x323   : > { %p2968_p5 = scmp.lt.u32.totalorder %s2966_s26, %s2962_s14  ;;  %p2970_p8 = scmp.lt.u32.totalorder %s2962_s14, %s4727_s17 }
 0x324   : > { %p2964_p2 = pnand %p2963_p1, %p3140_p9 }
 0x325   : > { %p2969_p6 = por %p2968_p5, %p2967_p4 }
 0x326   : > { %p2965_p3 = pneg %p2964_p2 }
 0x327   : > { %p2971_p12 = por %p2970_p8, %p2969_p6 }
 0x329   : > { %p2972_p13 = pnand %p2971_p12, %p2965_p3 }
 0x32b   : > { %2975 = shalt.err (!%p2972_p13)
}
 0x32c   : > { %2633 = dma.vmem_to_hbm [thread:$0]  (%p3140_p9), %s2471_s18, 32, %s4727_s17, %s2457_s29  }
 0x32d   : > { %s3056_s10 = smov [#allocation11]  }
 0x32e   : > { %s2481_s11 = sshll.u32 %s3056_s10, 4  ;;  %s2482_s11 = int_to_ptr.vmem [resolvable:$true] %s2481_s11 }
 0x32f   : > { %s2976_s12 = scalar_lea.vmem %s2482_s11, 16  ;;  %s2982_s15 = scalar_lea.vmem %s2482_s11, 32 }
 0x330   : > { %p2977_p0 = scmp.ne.s32.totalorder %s2482_s11, %s2976_s12  ;;  %p2983_p11 = scmp.lt.s32.totalorder %s2482_s11, %s2482_s11 }
 0x331   : > { %p2984_p4 = scmp.lt.s32.totalorder %s2982_s15, %s2976_s12 }
 0x332   : > { %p2978_p1 = pnand %p2977_p0, %p136_p7 }
 0x333   : > { %p2985_p5 = por %p2984_p4, %p2983_p11 }
 0x334   : > { %p2979_p2 = pneg %p2978_p1 }
 0x336   : > { %p2986_p6 = pnand %p2985_p5, %p2979_p2 }
 0x338   : > { %2989 = shalt.err (!%p2986_p6)
}
 0x339   : > { %s2990_s6 = scalar_lea.hbm %s4793_s5, 16 }
 0x33a   : > { %p2991_p9 = scmp.ne.s32.totalorder %s4793_s5, %s2990_s6  ;;  %p2996_p12 = scmp.lt.u32.totalorder %s2990_s6, %s4793_s5 }
 0x33c   : > { %p2992_p3 = pnand %p2991_p9, %p136_p7 }
 0x33e   : > { %p2993_p8 = pneg %p2992_p3 }
 0x340   : > { %p2998_p13 = pnand %p2996_p12, %p2993_p8 }
 0x342   : > { %3001 = shalt.err (!%p2998_p13)
}
 0x343   : > { %2635 = dma.vmem_to_hbm [thread:$0]  (%p136_p7), %s2482_s11, 16, %s4793_s5, [#allocation12]  }
 0x344   : > { %3023 = dma.done.wait (%p136_p7), [#allocation12], 16  }
 0x345   : > { %3025 = vsyncadd (%p136_p7), [#allocation12], 4294967280 }
 0x346 PF: > { %s2497_s24 = sand.u32 1, %s3032_s20   ;;  %p5252_p11 = scmp.ge.s32.totalorder %s3044_s23, 2 }
 0x347   : > { %s2498_s30 = scalar_lea.sflag [#allocation9], %s2497_s24 }
 0x348   : > { %p2640_p0 = pnand %p5252_p11, %p3144_p10 }
 0x34a   : > { %3027 = dma.done.wait (!%p2640_p0), %s2498_s30, 32  }
 0x34b   : > { %3029 = vsyncadd (!%p2640_p0), %s2498_s30, 4294967264  ;;  %p21_p1 = scmp.ge.s32.totalorder %s3115_s25, 4   ;;  %s5253_s20 = smov %s3036_s21 }
 0x34c   : > { %s5254_s21 = smov %s3040_s22  ;;  %s5255_s22 = smov %s3127_s28 }
 0x34d   : > { %s5256_s23 = smov %s3115_s25  ;;  %23 = sbr.rel (!%p21_p1) target bundleno = 8 (0x8), region = 105 }
 0x354   :  { %2503 = vsyncpa [#allocation8], 1 }
 0x355   :  { %2505 = vsyncpa [#allocation8 + $0x1], 1 }
 0x356   :  { %2506 = vsyncpa [#allocation9], 1 }
 0x357   :  { %2508 = vsyncpa [#allocation9 + $0x1], 1 }
 0x358   :  { %2509 = vsyncpa [#allocation12], 1 }

</bundles_post_ra>
